<compile_context>
chip_gen: v6e
topology: v6e:2x2x1
jax: 0.10.0
libtpu: 0.0.40
codegen_flags: <defaults>
</compile_context>

<pallas_src>
import jax
import jax.numpy as jnp
from jax.experimental import pallas as pl
from jax.experimental.pallas import tpu as pltpu

C_IN = 224          # conv2d6 in/out channels (fixed by the module)
C_SE = 8            # squeeze channels
TILE_HW_MAX = 1024  # pixels per grid step (review: sweep 1024-2048; ~4 MB VMEM incl. buffers)


def _se_conv_kernel(g_ref, w_ref, x_ref, o_ref):
    # out[co, p] = sum_ci (W6[co, ci] * g[ci]) * x[ci, p]
    # Fold the SE gate into the weight in f32 on the VPU, then feed bf16 to the
    # MXU with f32 accumulation.  Weight/gate blocks are grid-invariant
    # (constant index_map), so only the activation/output tiles stream from HBM.
    w_scaled = (w_ref[...] * g_ref[...]).astype(jnp.bfloat16)          # (224, 224)
    o_ref[...] = jnp.dot(w_scaled, x_ref[...].astype(jnp.bfloat16),
                         preferred_element_type=jnp.float32)           # (224, TILE) f32


def se_conv_forward(x12, x11, w4, b4, w5, b5, w6):
    """x12: (1,224,1,1)  x11: (1,224,H,W)  ->  (1,224,H,W)  (float32)."""
    N, C, H, W = x11.shape
    assert N == 1 and C == C_IN
    HW = H * W

    # --- SE gate (tiny: two 224x8 matmuls) computed once in the wrapper ---
    v = x12.reshape(1, C)                                                   # (1, 224)
    s = jnp.maximum(v @ jnp.transpose(w4.reshape(C_SE, C)) + b4[None, :], 0.0)  # (1, 8)
    g = jax.nn.sigmoid(s @ jnp.transpose(w5.reshape(C, C_SE)) + b5[None, :])    # (1, 224)

    w6_2d = w6.reshape(C_IN, C_IN)   # 1x1 kernel -> free reshape, stays f32
    x_rows = x11.reshape(C, HW)      # NCHW -> (C, H*W): free reshape

    # Pixel-axis tiling: either a multiple of 128 or the full extent (both
    # satisfy the (8,128) block constraint); the tail block uses masked stores.
    tile = HW if HW <= TILE_HW_MAX else TILE_HW_MAX
    grid = (pl.cdiv(HW, tile),)

    out_rows = pl.pallas_call(
        _se_conv_kernel,
        out_shape=jax.ShapeDtypeStruct((C_IN, HW), jnp.float32),
        grid_spec=pl.GridSpec(
            grid=grid,
            in_specs=[
                pl.BlockSpec((1, C_IN), lambda i: (0, 0)),      # gate (grid-invariant)
                pl.BlockSpec((C_IN, C_IN), lambda i: (0, 0)),   # weight (grid-invariant)
                pl.BlockSpec((C_IN, tile), lambda i: (0, i)),   # activation tile
            ],
            out_specs=pl.BlockSpec((C_IN, tile), lambda i: (0, i)),
        ),
        compiler_params=pltpu.CompilerParams(
            dimension_semantics=("parallel",)),
    )(g, w6_2d, x_rows)

    # (C, HW) -> (1, C, H, W): free reshape, no transpose.
    return out_rows.reshape(1, C_IN, H, W)


def _reference(x12, x11, w4, b4, w5, b5, w6):
    """Pure-JAX f32 reference of the same forward pass."""
    v = x12.reshape(1, C_IN)
    s = jnp.maximum(v @ jnp.transpose(w4.reshape(C_SE, C_IN)) + b4[None, :], 0.0)
    g = jax.nn.sigmoid(s @ jnp.transpose(w5.reshape(C_IN, C_SE)) + b5[None, :])
    gated = x11 * g.reshape(1, C_IN, 1, 1)
    H, W = x11.shape[2], x11.shape[3]
    x = gated.reshape(C_IN, H * W)
    out = w6.reshape(C_IN, C_IN) @ x
    return out.reshape(1, C_IN, H, W)


if __name__ == "__main__":
    key = jax.random.PRNGKey(0)
    k = jax.random.split(key, 7)

    # Module's native spatial size (56x56 -> HW=3136): total inputs ~3 MB, and it
    # exercises grid=4 (three full 1024-pixel tiles + one 64-pixel masked tail).
    H = Wd = 56
    x11 = jax.random.normal(k[0], (1, C_IN, H, Wd), dtype=jnp.float32)
    x12 = jax.random.normal(k[1], (1, C_IN, 1, 1), dtype=jnp.float32)

    # Deterministic parameter init (PyTorch-like uniform fan-in bound).
    def uinit(key, shape, fan_in):
        b = 1.0 / jnp.sqrt(fan_in)
        return jax.random.uniform(key, shape, jnp.float32, -b, b)

    w4 = uinit(k[2], (C_SE, C_IN, 1, 1), C_IN)
    b4 = uinit(k[3], (C_SE,), C_IN)
    w5 = uinit(k[4], (C_IN, C_SE, 1, 1), C_SE)
    b5 = uinit(k[5], (C_IN,), C_SE)
    w6 = uinit(k[6], (C_IN, C_IN, 1, 1), C_IN)  # conv2d6 has no bias

    out = se_conv_forward(x12, x11, w4, b4, w5, b5, w6)
    out = jax.block_until_ready(out)

    ref = _reference(x12, x11, w4, b4, w5, b5, w6)
    assert out.shape == (1, C_IN, H, Wd)
    # bf16 MXU inputs (f32 accumulation) vs. the pure-f32 reference.
    assert jnp.allclose(out, ref, atol=2e-2, rtol=2e-2)

    print("KERNEL_OK")
</pallas_src>

<mosaic_0001>
module attributes {stable_mosaic.version = 11 : i64} {
  func.func @_se_conv_kernel(%arg0: i32, %arg1: memref<1x224xf32, #tpu.memory_space<vmem>>, %arg2: memref<224x224xf32, #tpu.memory_space<vmem>>, %arg3: memref<224x1024xf32, #tpu.memory_space<vmem>>, %arg4: memref<224x1024xf32, #tpu.memory_space<vmem>>) attributes {dimension_semantics = [#tpu.dimension_semantics<parallel>], iteration_bounds = array<i64: 4>, scalar_prefetch = 0 : i64, scratch_operands = 0 : i64, tpu.core_type = #tpu.core_type<tc>, window_params = [{pipeline_mode = #tpu.pipeline_mode<synchronous>, transform_indices = @transform_0, window_bounds = array<i64: 1, 224>}, {pipeline_mode = #tpu.pipeline_mode<synchronous>, transform_indices = @transform_1, window_bounds = array<i64: 224, 224>}, {transform_indices = @transform_2, window_bounds = array<i64: 224, 1024>}, {transform_indices = @transform_3, window_bounds = array<i64: 224, 1024>}]} {
    %c0 = arith.constant 0 : index
    %c0_0 = arith.constant 0 : index
    %0 = vector.load %arg2[%c0, %c0_0] : memref<224x224xf32, #tpu.memory_space<vmem>>, vector<224x224xf32>
    %c0_1 = arith.constant 0 : index
    %c0_2 = arith.constant 0 : index
    %1 = vector.load %arg1[%c0_1, %c0_2] : memref<1x224xf32, #tpu.memory_space<vmem>>, vector<1x224xf32>
    %2 = vector.broadcast %1 : vector<1x224xf32> to vector<224x224xf32>
    %3 = arith.mulf %0, %2 : vector<224x224xf32>
    %4 = arith.truncf %3 : vector<224x224xf32> to vector<224x224xbf16>
    %c0_3 = arith.constant 0 : index
    %c0_4 = arith.constant 0 : index
    %5 = vector.load %arg3[%c0_3, %c0_4] : memref<224x1024xf32, #tpu.memory_space<vmem>>, vector<224x1024xf32>
    %6 = arith.truncf %5 : vector<224x1024xf32> to vector<224x1024xbf16>
    %cst = arith.constant dense<0.000000e+00> : vector<224x1024xf32>
    %7 = tpu.matmul %4, %6, %cst {dimension_numbers = #tpu.dot_dimension_numbers<[1], [0], [0], [1], [0, 0, 1, 1], [], []>} : vector<224x224xbf16>, vector<224x1024xbf16>, vector<224x1024xf32> -> vector<224x1024xf32>
    %c0_5 = arith.constant 0 : index
    %c0_6 = arith.constant 0 : index
    %8 = vector.load %arg4[%c0_5, %c0_6] : memref<224x1024xf32, #tpu.memory_space<vmem>>, vector<224x1024xf32>
    tpu.vector_store %arg4[%c0_5, %c0_6], %7 {strides = array<i32>} : memref<224x1024xf32, #tpu.memory_space<vmem>>, vector<224x1024xf32>,
    return
  }
  func.func @transform_0(%arg0: i32) -> (i32, i32) {
    %c0_i32 = arith.constant 0 : i32
    %c0_i32_0 = arith.constant 0 : i32
    %c0_i32_1 = arith.constant 0 : i32
    return %c0_i32, %c0_i32_0 : i32, i32
  }
  func.func @transform_1(%arg0: i32) -> (i32, i32) {
    %c0_i32 = arith.constant 0 : i32
    %c0_i32_0 = arith.constant 0 : i32
    %c0_i32_1 = arith.constant 0 : i32
    return %c0_i32, %c0_i32_0 : i32, i32
  }
  func.func @transform_2(%arg0: i32) -> (i32, i32) {
    %c0_i32 = arith.constant 0 : i32
    %c0_i32_0 = arith.constant 0 : i32
    return %c0_i32, %arg0 : i32, i32
  }
  func.func @transform_3(%arg0: i32) -> (i32, i32) {
    %c0_i32 = arith.constant 0 : i32
    %c0_i32_0 = arith.constant 0 : i32
    return %c0_i32, %arg0 : i32, i32
  }
}

</mosaic_0001>

<bundles_post_ra>
// kernel: tpu_custom_call.1
= control target key start
LH: loop header
LB: loop body
LE: loop exit
PB: predicated region body
PF: predicated region fallthrough
CT: control target
= control target key end

     0   :  { %8 = vsyncpa [#allocation3], 0  ;;  %s3093_s0 = inlined_call_operand.hbm [shape: f32[1,224], index: 0, kind: input, shape index: {}]   ;;  %s3094_s1 = inlined_call_operand.hbm [shape: f32[224,224], index: 1, kind: input, shape index: {}]   ;;  %s3095_s2 = inlined_call_operand.hbm [shape: f32[224,3136], index: 2, kind: input, shape index: {}]   ;;  %s3096_s3 = inlined_call_operand.hbm [shape: f32[224,3136], index: 3, kind: output, shape index: {}]  }
   0x1   :  { %9 = vsyncpa [#allocation6], 0 }
   0x2   :  { %10 = vsyncpa [#allocation4], 0 }
   0x3   :  { %12 = vsyncpa [#allocation4 + $0x1], 0  ;;  %s2122_s12 = smov 0   ;;  %s2124_s13 = smov 0  }
   0x4   :  { %s2126_s14 = smov 0   ;;  %s2128_s15 = smov 0  }
   0x5 LB: > { %s2143_s16 = sadd.s32 4294967295, %s2090_s15   ;;  %s1792_s17 = sadd.s32 4294967294, %s2090_s15   ;;  %s2090_s15 = sphi %s2128_s15, %s3118_s15   ;;  %s2086_s14 = sphi %s2126_s14, %s3117_s14   ;;  %s2082_s13 = sphi %s2124_s13, %s3116_s13   ;;  %s2078_s12 = sphi %s2122_s12, %s3115_s12  }
   0x6   : > { %s2147_s18 = sadd.s32 1, %s2090_s15   ;;  %s67_s19 = sadd.s32 1, %s2086_s14 }
   0x7   : > { %s64_s20 = ssub.s32 %s2090_s15, %s2147_s18  ;;  %p74_p0 = scmp.ne.s32.totalorder %s2086_s14, %s2082_s13 }
   0x8   : > { %p65_p1 = scmp.eq.s32.totalorder %s64_s20, 0  ;;  %p75_p2 = scmp.eq.s32.totalorder %s2090_s15, 0 }
   0x9   : > { %p80_p3 = scmp.ne.s32.totalorder %s2082_s13, %s2078_s12  ;;  %p3097_p4 = scmp.eq.s32.totalorder %s2143_s16, 0 }
   0xa   : > { %s2159_s21 = scalar_select %p65_p1, %s2086_s14, %s67_s19  }
   0xb   : > { %p2161_p5 = por %p75_p2, %p74_p0  ;;  %p2167_p6 = por %p3097_p4, %p80_p3 }
   0xc   : > { %p104_p7 = scmp.eq.s32.totalorder %s2143_s16, 3  ;;  %p110_p8 = scmp.eq.s32.totalorder %s1792_s17, 3 }
   0xd   : > { %s3100_s22 = scalar_select %p2161_p5, 1, 0 }
   0xe   : > { %s3101_s23 = scalar_select %p2167_p6, 1, 0 }
   0xf   : > { %p1793_p9 = scmp.ge.s32.totalorder %s2090_s15, 1  ;;  %p117_p10 = scmp.lt.s32.totalorder %s2090_s15, 5 }
  0x10   : > { %p2174_p11 = por %p104_p7, %p74_p0  ;;  %p2178_p12 = por %p110_p8, %p80_p3 }
  0x11   : > { %p2182_p13 = pnand %p1793_p9, %p117_p10  ;;  %s2092_s27 = smov [#allocation2]  }
  0x12   : > { %s3102_s24 = scalar_select %p2174_p11, 1, 0 }
  0x13   : > { %s3103_s25 = scalar_select %p2178_p12, 1, 0 }
  0x14   : > { %s3104_s26 = scalar_select %p2182_p13, 1, 0 }
  0x15   : > { %p1884_p1 = pneg %p2182_p13  ;;  %s130_s28 = sshll.u32 %s2092_s27, 4  ;;  %s131_s28 = int_to_ptr.vmem [resolvable:$true] %s130_s28 }
  0x16   : > { %s2093_s29 = smov [#allocation5]   ;;  %s1951_s5 = scalar_lea.vmem %s131_s28, 32 }
  0x17   : > { %s140_s30 = sshll.u32 %s2093_s29, 4  ;;  %p2190_p0 = pnand %p1884_p1, %p3097_p4  ;;  %s141_s30 = int_to_ptr.vmem [resolvable:$true] %s140_s30 }
  0x18   : > { %p1952_p3 = scmp.ne.s32.totalorder %s131_s28, %s1951_s5  ;;  %p1959_p9 = scmp.lt.s32.totalorder %s131_s28, %s131_s28 }
  0x19   : > { %p1942_p2 = pneg %p2190_p0  ;;  %p1960_p10 = scmp.lt.s32.totalorder %s1951_s5, %s1951_s5 }
  0x1b   : > { %p1954_p7 = pnand %p1952_p3, %p1942_p2  ;;  %p1961_p12 = por %p1960_p10, %p1959_p9 }
  0x1d   : > { %p1955_p8 = pneg %p1954_p7 }
  0x1f   : > { %p1962_p11 = pnand %p1961_p12, %p1955_p8 }
  0x21   : > { %1965 = shalt.err (!%p1962_p11)
}
  0x22   : > { %1887 = dma.hbm_to_vmem [thread:$0]  (!%p2190_p0), %s3093_s0, 32, %s131_s28, [#allocation3]  }
  0x23   : > { %s1977_s8 = scalar_lea.vmem %s141_s30, 7168  ;;  %p1985_p3 = scmp.lt.s32.totalorder %s141_s30, %s141_s30 }
  0x24   : > { %p1978_p1 = scmp.ne.s32.totalorder %s141_s30, %s1977_s8  ;;  %p1986_p7 = scmp.lt.s32.totalorder %s1977_s8, %s1977_s8 }
  0x26   : > { %p1980_p4 = pnand %p1978_p1, %p1942_p2  ;;  %p1987_p13 = por %p1986_p7, %p1985_p3 }
  0x28   : > { %p1981_p6 = pneg %p1980_p4 }
  0x2a   : > { %p1988_p5 = pnand %p1987_p13, %p1981_p6 }
  0x2c   : > { %1991 = shalt.err (!%p1988_p5)
}
  0x2d   : > { %s2094_s9 = smov 256   ;;  %s2095_s10 = smov 16  }
  0x2e   : > { %1890 = dma.hbm_to_vmem [thread:$0]  (!%p2190_p0), %s3094_s1, 7168, %s141_s30, [#allocation6], %s2094_s9, %s2094_s9, %s2095_s10  }
  0x2f   : > { %p1796_p11 = scmp.ge.s32.totalorder %s2090_s15, 4 }
  0x30   : > { %p3106_p12 = scmp.ne.s32.totalorder (!%p1796_p11), %s3100_s22, 0 }
  0x31   : > { %150 = sbr.rel (%p1796_p11) target bundleno = 87 (0x57), region = 24 }
  0x36   : > { %153 = sbr.rel (!%p3106_p12) target bundleno = 87 (0x57), region = 28  ;;  %s154_s19 = sand.u32 (%p3106_p12), 1, %s2090_s15  }
  0x37   : > { %s156_s20 = sand.u32 (%p3106_p12), 1, %s2086_s14   ;;  %s1797_s28 = sshll.u32 (%p3106_p12), %s2090_s15, 3 }
  0x38   : > { %s1872_s27 = smul.u32 (%p3106_p12), 1792, %s156_s20  ;;  %s160_s29 = ssub.s32 (%p3106_p12), 25, %s1797_s28 }
  0x39   : > { %p161_p4 = scmp.lt.s32.totalorder (%p3106_p12), %s160_s29, 8  ;;  %s2224_s5 = scalar_lea.sflag (%p3106_p12), [#allocation3], %s154_s19 }
  0x3a   : > { %s158_s22 = scalar_lea.vmem (%p3106_p12), [#allocation7], %s1872_s27 }
  0x3b   : > { %s3120_s29 = smov (!%p161_p4, %s160_s29), 8 }
  0x3c   : > { %s2221_s4 = smul.u32 3584, %s3120_s29 }
  0x3e   : > { %s165_s30 = ssub.s32 28672, %s2221_s4 }
  0x3f   : > { %166 = vsyncadd %s2224_s5, %s165_s30  ;;  %p1798_p5 = scmp.ne.s32.totalorder %s2221_s4, 0  ;;  %s1870_s6 = sshll.u32 %s2090_s15, 10 }
  0x40   : > { %s2232_s9 = scalar_lea.hbm %s3095_s2, %s1870_s6  ;;  %s1800_s10 = sshll.u32 %s3120_s29, 3 }
  0x41   : > { %s172_s11 = sshll.u32 %s158_s22, 4  ;;  %s1992_s17 = scalar_lea.hbm %s2232_s9, %s2221_s4  ;;  %s2235_s11 = int_to_ptr.vmem [resolvable:$true] %s172_s11 }
  0x42   : > { %p1993_p6 = scmp.ne.s32.totalorder %s2232_s9, %s1992_s17  ;;  %s1996_s27 = scalar_lea.hbm %s3095_s2, 89600 }
  0x43   : > { %p1997_p2 = scmp.lt.s32.totalorder %s2232_s9, %s3095_s2  ;;  %p1998_p8 = scmp.lt.s32.totalorder %s1996_s27, %s1992_s17 }
  0x44   : > { %p1994_p13 = pnand %p1993_p6, %p1798_p5 }
  0x45   : > { %p1999_p9 = por %p1998_p8, %p1997_p2 }
  0x46   : > { %p1995_p0 = pneg %p1994_p13 }
  0x48   : > { %p2000_p10 = pnand %p1999_p9, %p1995_p0 }
  0x4a   : > { %2003 = shalt.err (!%p2000_p10)
}
  0x4b   : > { %s2004_s22 = scalar_lea.vmem %s2235_s11, %s2221_s4  ;;  %s2096_s6 = smov [#allocation7]  }
  0x4c   : > { %p2005_p1 = scmp.ne.s32.totalorder %s2235_s11, %s2004_s22  ;;  %s2008_s7 = sshll.u32 %s2096_s6, 4  ;;  %s2009_s7 = int_to_ptr.vmem [resolvable:$false] %s2008_s7 }
  0x4d   : > { %s2010_s8 = scalar_lea.vmem %s2009_s7, 57344  ;;  %p2011_p11 = scmp.lt.s32.totalorder %s2235_s11, %s2009_s7 }
  0x4e   : > { %p2006_p3 = pnand %p2005_p1, %p1798_p5  ;;  %p2012_p12 = scmp.lt.s32.totalorder %s2010_s8, %s2004_s22 }
  0x50   : > { %p2007_p7 = pneg %p2006_p3  ;;  %p2013_p4 = por %p2012_p12, %p2011_p11 }
  0x52   : > { %p2014_p6 = pnand %p2013_p4, %p2007_p7 }
  0x54   : > { %2017 = shalt.err (!%p2014_p6)
}
  0x55   : > { %s2097_s17 = smov 3200   ;;  %s2098_s19 = smov 1024  }
  0x56   : > { %178 = dma.hbm_to_vmem [thread:$0]  (%p1798_p5), %s2232_s9, %s2221_s4, %s2235_s11, %s2224_s5, %s2097_s17, %s2098_s19, %s1800_s10  }
  0x57 PF: > { %p3107_p13 = scmp.ne.s32.totalorder %s3104_s26, 0 }
  0x58   : > { %p3108_p0 = scmp.eq.s32.totalorder (!%p3107_p13), %s2143_s16, 0 }
  0x59   : > { %184 = sbr.rel (%p3107_p13) target bundleno = 609 (0x261), region = 32 }
  0x5e   : > { %2061 = dma.done.wait (%p3108_p0), [#allocation3], 32   ;;  %p3109_p2 = pmov %p3108_p0 }
  0x5f   : > { %p3110_p8 = pmov %p3108_p0 }
  0x60   : > { %2063 = vsyncadd (%p3109_p2), [#allocation3], 4294967264 }
  0x61   : > { %2065 = dma.done.wait (%p3110_p8), [#allocation6], 7168   ;;  %p3111_p9 = pmov %p3108_p0 }
  0x62   : > { %s194_s29 = sand.u32 1, %s2143_s16   ;;  %s196_s4 = sand.u32 1, %s2082_s13  }
  0x63   : > { %2067 = vsyncadd (%p3111_p9), [#allocation6], 4294960128  ;;  %s2277_s26 = smul.u32 1792, %s196_s4  ;;  %s195_s5 = scalar_lea.sflag [#allocation3], %s194_s29 }
  0x64   : > { %p3112_p5 = scmp.ne.s32.totalorder %s3101_s23, 0 }
  0x65   : > { %s2280_s9 = scalar_lea.vmem [#allocation7], %s2277_s26 }
  0x66   : > { %2069 = dma.done.wait (%p3112_p5), %s195_s5, 28672  }
  0x67   : > { %2071 = vsyncadd (%p3112_p5), %s195_s5, 4294938624  ;;  %v497_v0 = vld [vmem:[%s2280_s9 + $0x388] sm:$0xff]  ;;  %v499_v2 = vld [vmem:[%s2280_s9 + $0x398] sm:$0xff]  ;;  %vm720_vm0 = vcmask 785408   ;;  %s2780_s23 = scalar_lea.vmem [#allocation8], %s2277_s26  ;;  %s3027_s10 = scalar_lea.sflag [#allocation4], %s196_s4 }
  0x68   : > { %v505_v1 = vld [vmem:[%s2280_s9 + $0x3c8] sm:$0xff]  ;;  %v507_v4 = vld [vmem:[%s2280_s9 + $0x3d8] sm:$0xff]  ;;  %v496_v5 = vld [vmem:[%s2280_s9 + $0x380] sm:$0xff]  ;;  %p3113_p10 = scmp.ne.s32.totalorder %s3102_s24, 0 }
  0x69   : > { %v665_v3 = vpack.c.bf16 %v505_v1, %v497_v0  ;;  %v504_v6 = vld [vmem:[%s2280_s9 + $0x3c0] sm:$0xff]  ;;  %v667_v7 = vpack.c.bf16 %v507_v4, %v499_v2  ;;  %v498_v9 = vld [vmem:[%s2280_s9 + $0x390] sm:$0xff]  ;;  %v481_v11 = vld [vmem:[%s2280_s9 + $0x308] sm:$0xff]  ;;  %s1862_s11 = sshll.u32 (%p3113_p10), %s2143_s16, 3 }
  0x6a   : > { %v664_v8 = vpack.c.bf16 %v504_v6, %v496_v5  ;;  %v506_v10 = vld [vmem:[%s2280_s9 + $0x3d0] sm:$0xff]  ;;  %v489_v13 = vld [vmem:[%s2280_s9 + $0x348] sm:$0xff]  ;;  %v483_v14 = vld [vmem:[%s2280_s9 + $0x318] sm:$0xff]  ;;  %s1688_s20 = ssub.s32 (%p3113_p10), 25, %s1862_s11 }
  0x6b   : > { %763 = vmatprep.subr.bf16.mxu0 %v665_v3  ;;  %v666_v12 = vpack.c.bf16 %v506_v10, %v498_v9  ;;  %v491_v15 = vld [vmem:[%s2280_s9 + $0x358] sm:$0xff]  ;;  %936 = vmatprep.subr.bf16.mxu1 %v667_v7  ;;  %v657_v16 = vpack.c.bf16 %v489_v13, %v481_v11  ;;  %v480_v18 = vld [vmem:[%s2280_s9 + $0x300] sm:$0xff]  ;;  %v482_v20 = vld [vmem:[%s2280_s9 + $0x310] sm:$0xff]  ;;  %p1689_p1 = scmp.lt.s32.totalorder (%p3113_p10), %s1688_s20, 8 }
  0x6c   : > { %764 = vmatpush1.bf16.msra.mxu0 %v664_v8  ;;  %v659_v17 = vpack.c.bf16 %v491_v15, %v483_v14  ;;  %v488_v19 = vld [vmem:[%s2280_s9 + $0x340] sm:$0xff]  ;;  %v490_v22 = vld [vmem:[%s2280_s9 + $0x350] sm:$0xff]  ;;  %v465_v23 = vld [vmem:[%s2280_s9 + $0x288] sm:$0xff] }
  0x6d   : > { %937 = vmatpush1.bf16.msra.mxu1 %v666_v12  ;;  %v656_v21 = vpack.c.bf16 %v488_v19, %v480_v18  ;;  %v473_v24 = vld [vmem:[%s2280_s9 + $0x2c8] sm:$0xff]  ;;  %765 = vmatprep.subr.bf16.mxu0 %v657_v16  ;;  %v658_v25 = vpack.c.bf16 %v490_v22, %v482_v20  ;;  %v467_v27 = vld [vmem:[%s2280_s9 + $0x298] sm:$0xff]  ;;  %v464_v29 = vld [vmem:[%s2280_s9 + $0x280] sm:$0xff] }
  0x6e   : > { %938 = vmatprep.subr.bf16.mxu1 %v659_v17  ;;  %v649_v26 = vpack.c.bf16 %v473_v24, %v465_v23  ;;  %v475_v28 = vld [vmem:[%s2280_s9 + $0x2d8] sm:$0xff]  ;;  %v472_v31 = vld [vmem:[%s2280_s9 + $0x2c0] sm:$0xff]  ;;  %v466_v32 = vld [vmem:[%s2280_s9 + $0x290] sm:$0xff] }
  0x6f   : > { %v651_v30 = vpack.c.bf16 %v475_v28, %v467_v27  ;;  %v474_v33 = vld [vmem:[%s2280_s9 + $0x2d0] sm:$0xff]  ;;  %v648_v34 = vpack.c.bf16 %v472_v31, %v464_v29  ;;  %v449_v35 = vld [vmem:[%s2280_s9 + $0x208] sm:$0xff]  ;;  %v451_v37 = vld [vmem:[%s2280_s9 + $0x218] sm:$0xff] }
  0x70   : > { %766 = vmatpush1.bf16.msra.mxu0 %v656_v21  ;;  %v457_v36 = vld [vmem:[%s2280_s9 + $0x248] sm:$0xff]  ;;  %v650_v38 = vpack.c.bf16 %v474_v33, %v466_v32  ;;  %v459_v40 = vld [vmem:[%s2280_s9 + $0x258] sm:$0xff]  ;;  %v448_v41 = vld [vmem:[%s2280_s9 + $0x200] sm:$0xff] }
  0x71   : > { %939 = vmatpush1.bf16.msra.mxu1 %v658_v25  ;;  %767 = vmatprep.subr.bf16.mxu0 %v649_v26  ;;  %v641_v39 = vpack.c.bf16 %v457_v36, %v449_v35  ;;  %v456_v42 = vld [vmem:[%s2280_s9 + $0x240] sm:$0xff]  ;;  %v643_v43 = vpack.c.bf16 %v459_v40, %v451_v37  ;;  %v450_v44 = vld [vmem:[%s2280_s9 + $0x210] sm:$0xff]  ;;  %v433_v46 = vld [vmem:[%s2280_s9 + $0x188] sm:$0xff] }
  0x72   : > { %940 = vmatprep.subr.bf16.mxu1 %v651_v30  ;;  %v458_v45 = vld [vmem:[%s2280_s9 + $0x250] sm:$0xff]  ;;  %v441_v47 = vld [vmem:[%s2280_s9 + $0x1c8] sm:$0xff]  ;;  %v435_v48 = vld [vmem:[%s2280_s9 + $0x198] sm:$0xff]  ;;  %v640_v50 = vpack.c.bf16 %v456_v42, %v448_v41 }
  0x73   : > { %v443_v49 = vld [vmem:[%s2280_s9 + $0x1d8] sm:$0xff]  ;;  %v642_v51 = vpack.c.bf16 %v458_v45, %v450_v44  ;;  %v633_v52 = vpack.c.bf16 %v441_v47, %v433_v46  ;;  %v432_v53 = vld [vmem:[%s2280_s9 + $0x180] sm:$0xff]  ;;  %v434_v55 = vld [vmem:[%s2280_s9 + $0x190] sm:$0xff] }
  0x74   : > { %768 = vmatpush1.bf16.msra.mxu0 %v648_v34  ;;  %v440_v54 = vld [vmem:[%s2280_s9 + $0x1c0] sm:$0xff]  ;;  %v635_v56 = vpack.c.bf16 %v443_v49, %v435_v48  ;;  %v442_v57 = vld [vmem:[%s2280_s9 + $0x1d0] sm:$0xff]  ;;  %v417_v58 = vld [vmem:[%s2280_s9 + $0x108] sm:$0xff]  ;;  %v290_v34 = vlaneseq }
  0x75   : > { %941 = vmatpush1.bf16.msra.mxu1 %v650_v38  ;;  %769 = vmatprep.subr.bf16.mxu0 %v641_v39  ;;  %v425_v59 = vld [vmem:[%s2280_s9 + $0x148] sm:$0xff]  ;;  %v419_v60 = vld [vmem:[%s2280_s9 + $0x118] sm:$0xff]  ;;  %v632_v62 = vpack.c.bf16 %v440_v54, %v432_v53  ;;  %v634_v63 = vpack.c.bf16 %v442_v57, %v434_v55  ;;  %v416_v1 = vld [vmem:[%s2280_s9 + $0x100] sm:$0xff] }
  0x76   : > { %942 = vmatprep.subr.bf16.mxu1 %v643_v43  ;;  %v427_v61 = vld [vmem:[%s2280_s9 + $0x158] sm:$0xff]  ;;  %v625_v0 = vpack.c.bf16 %v425_v59, %v417_v58  ;;  %v424_v2 = vld [vmem:[%s2280_s9 + $0x140] sm:$0xff]  ;;  %v418_v3 = vld [vmem:[%s2280_s9 + $0x110] sm:$0xff]  ;;  %v2362_v47 = vshrl.u32 %v290_v34, 7 }
  0x77   : > { %v627_v4 = vpack.c.bf16 %v427_v61, %v419_v60  ;;  %v426_v5 = vld [vmem:[%s2280_s9 + $0x150] sm:$0xff]  ;;  %v401_v6 = vld [vmem:[%s2280_s9 + $0x88] sm:$0xff]  ;;  %v403_v8 = vld [vmem:[%s2280_s9 + $0x98] sm:$0xff]  ;;  %v624_v10 = vpack.c.bf16 %v424_v2, %v416_v1 }
  0x78   : > { %770 = vmatpush1.bf16.msra.mxu0 %v640_v50  ;;  %v409_v7 = vld [vmem:[%s2280_s9 + $0xc8] sm:$0xff]  ;;  %v411_v9 = vld [vmem:[%s2280_s9 + $0xd8] sm:$0xff]  ;;  %v626_v11 = vpack.c.bf16 %v426_v5, %v418_v3  ;;  %v400_v13 = vld [vmem:[%s2280_s9 + $0x80] sm:$0xff]  ;;  %v296_v60 = vsub.s32 1, %v2362_v47 }
  0x79   : > { %943 = vmatpush1.bf16.msra.mxu1 %v642_v51  ;;  %771 = vmatprep.subr.bf16.mxu0 %v633_v52  ;;  %v617_v12 = vpack.c.bf16 %v409_v7, %v401_v6  ;;  %v408_v14 = vld [vmem:[%s2280_s9 + $0xc0] sm:$0xff]  ;;  %v402_v15 = vld [vmem:[%s2280_s9 + $0x90] sm:$0xff]  ;;  %v619_v16 = vpack.c.bf16 %v411_v9, %v403_v8  ;;  %v385_v18 = vld [vmem:[%s2280_s9 + $0x8] sm:$0xff] }
  0x7a   : > { %944 = vmatprep.subr.bf16.mxu1 %v635_v56  ;;  %v410_v17 = vld [vmem:[%s2280_s9 + $0xd0] sm:$0xff]  ;;  %v393_v19 = vld [vmem:[%s2280_s9 + $0x48] sm:$0xff]  ;;  %v387_v20 = vld [vmem:[%s2280_s9 + $0x18] sm:$0xff]  ;;  %v616_v22 = vpack.c.bf16 %v408_v14, %v400_v13 }
  0x7b   : > { %v395_v21 = vld [vmem:[%s2280_s9 + $0x58] sm:$0xff]  ;;  %v618_v23 = vpack.c.bf16 %v410_v17, %v402_v15  ;;  %v609_v24 = vpack.c.bf16 %v393_v19, %v385_v18  ;;  %v384_v25 = vld [vmem:[%s2280_s9] sm:$0xff]  ;;  %v386_v27 = vld [vmem:[%s2280_s9 + $0x10] sm:$0xff] }
  0x7c   : > { %772 = vmatpush1.bf16.msra.mxu0 %v632_v62  ;;  %v392_v26 = vld [vmem:[%s2280_s9 + $0x40] sm:$0xff]  ;;  %v611_v28 = vpack.c.bf16 %v395_v21, %v387_v20  ;;  %v394_v29 = vld [vmem:[%s2280_s9 + $0x50] sm:$0xff]  ;;  %v593_v30 = vld [vmem:[%s2280_s9 + $0x688] sm:$0xff] }
  0x7d   : > { %945 = vmatpush1.bf16.msra.mxu1 %v634_v63  ;;  %773 = vmatprep.subr.bf16.mxu0 %v625_v0  ;;  %v601_v31 = vld [vmem:[%s2280_s9 + $0x6c8] sm:$0xff]  ;;  %v595_v32 = vld [vmem:[%s2280_s9 + $0x698] sm:$0xff]  ;;  %v608_v35 = vpack.c.bf16 %v392_v26, %v384_v25  ;;  %v610_v36 = vpack.c.bf16 %v394_v29, %v386_v27  ;;  %v592_v38 = vld [vmem:[%s2280_s9 + $0x680] sm:$0xff] }
  0x7e   : > { %946 = vmatprep.subr.bf16.mxu1 %v627_v4  ;;  %v603_v33 = vld [vmem:[%s2280_s9 + $0x6d8] sm:$0xff]  ;;  %v713_v37 = vpack.c.bf16 %v601_v31, %v593_v30  ;;  %v600_v39 = vld [vmem:[%s2280_s9 + $0x6c0] sm:$0xff]  ;;  %v594_v40 = vld [vmem:[%s2280_s9 + $0x690] sm:$0xff] }
  0x7f   : > { %v715_v41 = vpack.c.bf16 %v603_v33, %v595_v32  ;;  %v602_v42 = vld [vmem:[%s2280_s9 + $0x6d0] sm:$0xff]  ;;  %v577_v43 = vld [vmem:[%s2280_s9 + $0x608] sm:$0xff]  ;;  %v579_v45 = vld [vmem:[%s2280_s9 + $0x618] sm:$0xff]  ;;  %v712_v48 = vpack.c.bf16 %v600_v39, %v592_v38 }
  0x80   : > { %774 = vmatpush1.bf16.msra.mxu0 %v624_v10  ;;  %v585_v44 = vld [vmem:[%s2280_s9 + $0x648] sm:$0xff]  ;;  %v587_v46 = vld [vmem:[%s2280_s9 + $0x658] sm:$0xff]  ;;  %v714_v49 = vpack.c.bf16 %v602_v42, %v594_v40  ;;  %v576_v51 = vld [vmem:[%s2280_s9 + $0x600] sm:$0xff] }
  0x81   : > { %947 = vmatpush1.bf16.msra.mxu1 %v626_v11  ;;  %775 = vmatprep.subr.bf16.mxu0 %v617_v12  ;;  %v705_v50 = vpack.c.bf16 %v585_v44, %v577_v43  ;;  %v584_v52 = vld [vmem:[%s2280_s9 + $0x640] sm:$0xff]  ;;  %v578_v53 = vld [vmem:[%s2280_s9 + $0x610] sm:$0xff]  ;;  %v707_v54 = vpack.c.bf16 %v587_v46, %v579_v45  ;;  %v561_v56 = vld [vmem:[%s2280_s9 + $0x588] sm:$0xff] }
  0x82   : > { %948 = vmatprep.subr.bf16.mxu1 %v619_v16  ;;  %v586_v55 = vld [vmem:[%s2280_s9 + $0x650] sm:$0xff]  ;;  %v569_v57 = vld [vmem:[%s2280_s9 + $0x5c8] sm:$0xff]  ;;  %v563_v58 = vld [vmem:[%s2280_s9 + $0x598] sm:$0xff]  ;;  %v704_v61 = vpack.c.bf16 %v584_v52, %v576_v51 }
  0x83   : > { %v571_v59 = vld [vmem:[%s2280_s9 + $0x5d8] sm:$0xff]  ;;  %v560_v62 = vld [vmem:[%s2280_s9 + $0x580] sm:$0xff]  ;;  %v562_v0 = vld [vmem:[%s2280_s9 + $0x590] sm:$0xff]  ;;  %v706_v1 = vpack.c.bf16 %v586_v55, %v578_v53  ;;  %v697_v2 = vpack.c.bf16 %v569_v57, %v561_v56 }
  0x84   : > { %776 = vmatpush1.bf16.msra.mxu0 %v616_v22  ;;  %v568_v63 = vld [vmem:[%s2280_s9 + $0x5c0] sm:$0xff]  ;;  %v570_v3 = vld [vmem:[%s2280_s9 + $0x5d0] sm:$0xff]  ;;  %v545_v4 = vld [vmem:[%s2280_s9 + $0x508] sm:$0xff]  ;;  %v699_v6 = vpack.c.bf16 %v571_v59, %v563_v58 }
  0x85   : > { %949 = vmatpush1.bf16.msra.mxu1 %v618_v23  ;;  %777 = vmatprep.subr.bf16.mxu0 %v609_v24  ;;  %v553_v5 = vld [vmem:[%s2280_s9 + $0x548] sm:$0xff]  ;;  %v235_v8 = vld [vmem:[#allocation5 + $0x18] sm:$0xff]  ;;  %v696_v13 = vpack.c.bf16 %v568_v63, %v560_v62  ;;  %v698_v14 = vpack.c.bf16 %v570_v3, %v562_v0  ;;  %v544_v16 = vld [vmem:[%s2280_s9 + $0x500] sm:$0xff] }
  0x86   : > { %950 = vmatprep.subr.bf16.mxu1 %v611_v28  ;;  %v233_v7 = vld [vmem:[#allocation5 + $0x8] sm:$0xff]  ;;  %v288_v9 = vld [vmem:[#allocation2] sm:$0x3]  ;;  %v689_v15 = vpack.c.bf16 %v553_v5, %v545_v4  ;;  %v552_v17 = vld [vmem:[%s2280_s9 + $0x540] sm:$0xff]  ;;  %v292_v28 = vsub.s32 0, %v2362_v47 }
  0x87   : > { %v547_v10 = vld [vmem:[%s2280_s9 + $0x518] sm:$0xff]  ;;  %v2381_v12 = vrot.slane %v288_v9, %v296_v60  ;;  %v546_v18 = vld [vmem:[%s2280_s9 + $0x510] sm:$0xff]  ;;  %v529_v23 = vld [vmem:[%s2280_s9 + $0x488] sm:$0xff]  ;;  %v688_v29 = vpack.c.bf16 %v552_v17, %v544_v16 }
  0x88   : > { %778 = vmatpush1.bf16.msra.mxu0 %v608_v35  ;;  %v555_v11 = vld [vmem:[%s2280_s9 + $0x558] sm:$0xff]  ;;  %v554_v22 = vld [vmem:[%s2280_s9 + $0x550] sm:$0xff]  ;;  %v537_v24 = vld [vmem:[%s2280_s9 + $0x4c8] sm:$0xff]  ;;  %v2409_v42 = vrot.slane %v288_v9, %v292_v28 }
  0x89   : > { %951 = vmatpush1.bf16.msra.mxu1 %v610_v36  ;;  %783 = vmatprep.subr.bf16.mxu0 %v713_v37  ;;  %v301_v19 = vmul.f32 %v2381_v12, %v233_v7  ;;  %v303_v20 = vmul.f32 %v2381_v12, %v235_v8  ;;  %v691_v21 = vpack.c.bf16 %v555_v11, %v547_v10  ;;  %v531_v25 = vld [vmem:[%s2280_s9 + $0x498] sm:$0xff]  ;;  %v528_v32 = vld [vmem:[%s2280_s9 + $0x480] sm:$0xff]  ;;  %v530_v34 = vld [vmem:[%s2280_s9 + $0x490] sm:$0xff] }
  0x8a   : > { %956 = vmatprep.subr.bf16.mxu1 %v715_v41  ;;  %v539_v26 = vld [vmem:[%s2280_s9 + $0x4d8] sm:$0xff]  ;;  %v690_v30 = vpack.c.bf16 %v554_v22, %v546_v18  ;;  %v681_v31 = vpack.c.bf16 %v537_v24, %v529_v23  ;;  %v536_v33 = vld [vmem:[%s2280_s9 + $0x4c0] sm:$0xff]  ;;  %v538_v36 = vld [vmem:[%s2280_s9 + $0x4d0] sm:$0xff] }
  0x8b   : > { %v2393_v27 = vpack.c.bf16 %v303_v20, %v301_v19  ;;  %v683_v35 = vpack.c.bf16 %v539_v26, %v531_v25  ;;  %v513_v37 = vld [vmem:[%s2280_s9 + $0x408] sm:$0xff]  ;;  %v515_v39 = vld [vmem:[%s2280_s9 + $0x418] sm:$0xff]  ;;  %v512_v41 = vld [vmem:[%s2280_s9 + $0x400] sm:$0xff]  ;;  %v680_v43 = vpack.c.bf16 %v536_v33, %v528_v32  ;;  %v682_v47 = vpack.c.bf16 %v538_v36, %v530_v34 }
  0x8c   : > { %784 = vmatpush2.bf16.msra.mxu0 %v712_v48  ;;  %v521_v38 = vld [vmem:[%s2280_s9 + $0x448] sm:$0xff]  ;;  %v523_v40 = vld [vmem:[%s2280_s9 + $0x458] sm:$0xff]  ;;  %v520_v44 = vld [vmem:[%s2280_s9 + $0x440] sm:$0xff] }
  0x8d   : > { %957 = vmatpush2.bf16.msra.mxu1 %v714_v49  ;;  %785 = vmatprep.subr.bf16.mxu0 %v705_v50  ;;  %v232_v45 = vld [vmem:[#allocation5] sm:$0xff]  ;;  %v234_v46 = vld [vmem:[#allocation5 + $0x10] sm:$0xff]  ;;  %v673_v48 = vpack.c.bf16 %v521_v38, %v513_v37  ;;  %v501_v51 = vld [vmem:[%s2280_s9 + $0x3a8] sm:$0xff]  ;;  %v675_v52 = vpack.c.bf16 %v523_v40, %v515_v39  ;;  %v672_v60 = vpack.c.bf16 %v520_v44, %v512_v41 }
  0x8e   : > { %958 = vmatprep.subr.bf16.mxu1 %v707_v54  ;;  %1806 = vmatprep.mubr.msk.bf16.mxu0 %vm720_vm0, %v2393_v27  ;;  %v514_v49 = vld [vmem:[%s2280_s9 + $0x410] sm:$0xff]  ;;  %v509_v53 = vld [vmem:[%s2280_s9 + $0x3e8] sm:$0xff]  ;;  %v239_v55 = vld [vmem:[#allocation5 + $0x38] sm:$0xff]  ;;  %v300_v56 = vmul.f32 %v2409_v42, %v232_v45  ;;  %v302_v57 = vmul.f32 %v2409_v42, %v234_v46 }
  0x8f   : > { %1820 = vmatprep.mubr.msk.bf16.mxu1 %vm720_vm0, %v2393_v27  ;;  %v522_v50 = vld [vmem:[%s2280_s9 + $0x450] sm:$0xff]  ;;  %v237_v54 = vld [vmem:[#allocation5 + $0x28] sm:$0xff]  ;;  %v503_v58 = vld [vmem:[%s2280_s9 + $0x3b8] sm:$0xff]  ;;  %v669_v62 = vpack.c.bf16 %v509_v53, %v501_v51  ;;  %v307_v3 = vmul.f32 %v2381_v12, %v239_v55 }
  0x90   : > { %786 = vmatpush2.bf16.msra.mxu0 %v704_v61  ;;  %v511_v59 = vld [vmem:[%s2280_s9 + $0x3f8] sm:$0xff]  ;;  %v674_v61 = vpack.c.bf16 %v522_v50, %v514_v49  ;;  %v500_v63 = vld [vmem:[%s2280_s9 + $0x3a0] sm:$0xff]  ;;  %v510_v5 = vld [vmem:[%s2280_s9 + $0x3f0] sm:$0xff]  ;;  %v2426_v8 = vpack.c.bf16 %v302_v57, %v300_v56 }
  0x91   : > { %959 = vmatpush2.bf16.msra.mxu1 %v706_v1  ;;  %787 = vmatprep.subr.bf16.mxu0 %v697_v2  ;;  %v508_v0 = vld [vmem:[%s2280_s9 + $0x3e0] sm:$0xff]  ;;  %v502_v1 = vld [vmem:[%s2280_s9 + $0x3b0] sm:$0xff]  ;;  %v305_v2 = vmul.f32 %v2381_v12, %v237_v54  ;;  %v671_v4 = vpack.c.bf16 %v511_v59, %v503_v58  ;;  %v485_v9 = vld [vmem:[%s2280_s9 + $0x328] sm:$0xff] }
  0x92   : > { %960 = vmatprep.subr.bf16.mxu1 %v699_v6  ;;  %v236_v6 = vld [vmem:[#allocation5 + $0x20] sm:$0xff]  ;;  %v238_v7 = vld [vmem:[#allocation5 + $0x30] sm:$0xff]  ;;  %v493_v10 = vld [vmem:[%s2280_s9 + $0x368] sm:$0xff]  ;;  %v670_v17 = vpack.c.bf16 %v510_v5, %v502_v1 }
  0x93   : > { %v487_v11 = vld [vmem:[%s2280_s9 + $0x338] sm:$0xff]  ;;  %v492_v16 = vld [vmem:[%s2280_s9 + $0x360] sm:$0xff]  ;;  %v2434_v18 = vpack.c.bf16 %v307_v3, %v305_v2  ;;  %v486_v19 = vld [vmem:[%s2280_s9 + $0x330] sm:$0xff]  ;;  %v661_v22 = vpack.c.bf16 %v493_v10, %v485_v9  ;;  %v304_v26 = vmul.f32 %v2409_v42, %v236_v6  ;;  %v306_v28 = vmul.f32 %v2409_v42, %v238_v7 }
  0x94   : > { %788 = vmatpush2.bf16.msra.mxu0 %v696_v13  ;;  %v668_v13 = vpack.c.bf16 %v508_v0, %v500_v63  ;;  %v241_v20 = vld [vmem:[#allocation5 + $0x48] sm:$0xff]  ;;  %v494_v23 = vld [vmem:[%s2280_s9 + $0x370] sm:$0xff]  ;;  %v240_v37 = vld [vmem:[#allocation5 + $0x40] sm:$0xff] }
  0x95   : > { %961 = vmatpush2.bf16.msra.mxu1 %v698_v14  ;;  %789 = vmatprep.subr.bf16.mxu0 %v689_v15  ;;  %v495_v14 = vld [vmem:[%s2280_s9 + $0x378] sm:$0xff]  ;;  %v484_v15 = vld [vmem:[%s2280_s9 + $0x320] sm:$0xff]  ;;  %v469_v24 = vld [vmem:[%s2280_s9 + $0x2a8] sm:$0xff]  ;;  %v309_v33 = vmul.f32 %v2381_v12, %v241_v20  ;;  %v308_v59 = vmul.f32 %v2409_v42, %v240_v37 }
  0x96   : > { %962 = vmatprep.subr.bf16.mxu1 %v691_v21  ;;  %v243_v21 = vld [vmem:[#allocation5 + $0x58] sm:$0xff]  ;;  %v477_v25 = vld [vmem:[%s2280_s9 + $0x2e8] sm:$0xff]  ;;  %v660_v32 = vpack.c.bf16 %v492_v16, %v484_v15  ;;  %v468_v39 = vld [vmem:[%s2280_s9 + $0x2a0] sm:$0xff] }
  0x97   : > { %v311_v34 = vmul.f32 %v2381_v12, %v243_v21  ;;  %v653_v36 = vpack.c.bf16 %v477_v25, %v469_v24  ;;  %v476_v40 = vld [vmem:[%s2280_s9 + $0x2e0] sm:$0xff]  ;;  %v470_v41 = vld [vmem:[%s2280_s9 + $0x2b0] sm:$0xff]  ;;  %v453_v45 = vld [vmem:[%s2280_s9 + $0x228] sm:$0xff] }
  0x98   : > { %790 = vmatpush2.bf16.msra.mxu0 %v688_v29  ;;  %v663_v29 = vpack.c.bf16 %v495_v14, %v487_v11  ;;  %v478_v44 = vld [vmem:[%s2280_s9 + $0x2f0] sm:$0xff]  ;;  %v461_v46 = vld [vmem:[%s2280_s9 + $0x268] sm:$0xff]  ;;  %v455_v49 = vld [vmem:[%s2280_s9 + $0x238] sm:$0xff]  ;;  %v652_v51 = vpack.c.bf16 %v476_v40, %v468_v39 }
  0x99   : > { %963 = vmatpush2.bf16.msra.mxu1 %v690_v30  ;;  %791 = vmatprep.subr.bf16.mxu0 %v681_v31  ;;  %v471_v30 = vld [vmem:[%s2280_s9 + $0x2b8] sm:$0xff]  ;;  %v654_v54 = vpack.c.bf16 %v478_v44, %v470_v41  ;;  %v645_v55 = vpack.c.bf16 %v461_v46, %v453_v45  ;;  %v452_v56 = vld [vmem:[%s2280_s9 + $0x220] sm:$0xff]  ;;  %v454_v58 = vld [vmem:[%s2280_s9 + $0x230] sm:$0xff] }
  0x9a   : > { %964 = vmatprep.subr.bf16.mxu1 %v683_v35  ;;  %v479_v31 = vld [vmem:[%s2280_s9 + $0x2f8] sm:$0xff]  ;;  %v662_v35 = vpack.c.bf16 %v494_v23, %v486_v19  ;;  %v460_v57 = vld [vmem:[%s2280_s9 + $0x260] sm:$0xff]  ;;  %v437_v63 = vld [vmem:[%s2280_s9 + $0x1a8] sm:$0xff] }
  0x9b   : > { %v655_v38 = vpack.c.bf16 %v479_v31, %v471_v30  ;;  %v463_v50 = vld [vmem:[%s2280_s9 + $0x278] sm:$0xff]  ;;  %v445_v0 = vld [vmem:[%s2280_s9 + $0x1e8] sm:$0xff]  ;;  %v644_v5 = vpack.c.bf16 %v460_v57, %v452_v56  ;;  %v244_v6 = vld [vmem:[#allocation5 + $0x60] sm:$0xff] }
  0x9c   : > { %792 = vmatpush2.bf16.msra.mxu0 %v680_v43  ;;  %v2455_v43 = vpack.c.bf16 %v306_v28, %v304_v26  ;;  %v247_v53 = vld [vmem:[#allocation5 + $0x78] sm:$0xff]  ;;  %v637_v9 = vpack.c.bf16 %v445_v0, %v437_v63  ;;  %v436_v10 = vld [vmem:[%s2280_s9 + $0x1a0] sm:$0xff]  ;;  %v446_v16 = vld [vmem:[%s2280_s9 + $0x1f0] sm:$0xff] }
  0x9d   : > { %965 = vmatpush2.bf16.msra.mxu1 %v682_v47  ;;  %793 = vmatprep.subr.bf16.mxu0 %v673_v48  ;;  %v2460_v47 = vpack.c.bf16 %v311_v34, %v309_v33  ;;  %v242_v48 = vld [vmem:[#allocation5 + $0x50] sm:$0xff]  ;;  %v315_v2 = vmul.f32 %v2381_v12, %v247_v53  ;;  %v439_v3 = vld [vmem:[%s2280_s9 + $0x1b8] sm:$0xff]  ;;  %v444_v11 = vld [vmem:[%s2280_s9 + $0x1e0] sm:$0xff]  ;;  %v312_v33 = vmul.f32 %v2409_v42, %v244_v6 }
  0x9e   : > { %966 = vmatprep.subr.bf16.mxu1 %v675_v52  ;;  %v245_v52 = vld [vmem:[#allocation5 + $0x68] sm:$0xff]  ;;  %v246_v21 = vld [vmem:[#allocation5 + $0x70] sm:$0xff]  ;;  %v431_v23 = vld [vmem:[%s2280_s9 + $0x178] sm:$0xff]  ;;  %v636_v26 = vpack.c.bf16 %v444_v11, %v436_v10 }
  0x9f   : > { %v313_v1 = vmul.f32 %v2381_v12, %v245_v52  ;;  %v429_v19 = vld [vmem:[%s2280_s9 + $0x168] sm:$0xff]  ;;  %v251_v25 = vld [vmem:[#allocation5 + $0x98] sm:$0xff]  ;;  %v420_v30 = vld [vmem:[%s2280_s9 + $0x120] sm:$0xff]  ;;  %v314_v34 = vmul.f32 %v2409_v42, %v246_v21 }
  0xa0   : > { %794 = vmatpush2.bf16.msra.mxu0 %v672_v60  ;;  %v310_v60 = vmul.f32 %v2409_v42, %v242_v48  ;;  %v249_v24 = vld [vmem:[#allocation5 + $0x88] sm:$0xff]  ;;  %v428_v31 = vld [vmem:[%s2280_s9 + $0x160] sm:$0xff]  ;;  %v319_v40 = vmul.f32 %v2381_v12, %v251_v25  ;;  %v407_v41 = vld [vmem:[%s2280_s9 + $0xb8] sm:$0xff] }
  0xa1   : > { %967 = vmatpush2.bf16.msra.mxu1 %v674_v61  ;;  %1109 = vmatprep.subr.bf16.mxu0 %v669_v62  ;;  %v647_v61 = vpack.c.bf16 %v463_v50, %v455_v49  ;;  %v462_v62 = vld [vmem:[%s2280_s9 + $0x270] sm:$0xff]  ;;  %v2490_v20 = vpack.c.bf16 %v315_v2, %v313_v1  ;;  %v405_v37 = vld [vmem:[%s2280_s9 + $0xa8] sm:$0xff]  ;;  %v317_v39 = vmul.f32 %v2381_v12, %v249_v24  ;;  %v415_v44 = vld [vmem:[%s2280_s9 + $0xf8] sm:$0xff] }
  0xa2   : > { %1282 = vmatprep.subr.bf16.mxu1 %v671_v4  ;;  %v447_v4 = vld [vmem:[%s2280_s9 + $0x1f8] sm:$0xff]  ;;  %v646_v7 = vpack.c.bf16 %v462_v62, %v454_v58  ;;  %v2485_v14 = vpack.c.bf16 %v310_v60, %v308_v59  ;;  %v628_v45 = vpack.c.bf16 %v428_v31, %v420_v30  ;;  %v248_v46 = vld [vmem:[#allocation5 + $0x80] sm:$0xff]  ;;  %v406_v52 = vld [vmem:[%s2280_s9 + $0xb0] sm:$0xff]  ;;  %v2515_v53 = vpack.c.bf16 %v314_v34, %v312_v33 }
  0xa3   : > { %796 = vmatmul.mubr.bf16.vlgmr.msra.gmra.mxu0 %v2426_v8  ;;  %v639_v15 = vpack.c.bf16 %v447_v4, %v439_v3  ;;  %v404_v50 = vld [vmem:[%s2280_s9 + $0xa0] sm:$0xff]  ;;  %v389_v56 = vld [vmem:[%s2280_s9 + $0x28] sm:$0xff]  ;;  %v2520_v58 = vpack.c.bf16 %v319_v40, %v317_v39  ;;  %v250_v59 = vld [vmem:[#allocation5 + $0x90] sm:$0xff]  ;;  %v316_v6 = vmul.f32 %v2409_v42, %v248_v46 }
  0xa4   : > { %969 = vmatmul.mubr.bf16.vlgmr.msra.gmra.mxu1 %v2426_v8  ;;  %1110 = vmatpush1.bf16.msra.mxu0 %v668_v13  ;;  %v438_v13 = vld [vmem:[%s2280_s9 + $0x1b0] sm:$0xff]  ;;  %v397_v57 = vld [vmem:[%s2280_s9 + $0x68] sm:$0xff]  ;;  %v391_v60 = vld [vmem:[%s2280_s9 + $0x38] sm:$0xff] }
  0xa5   : > { %1283 = vmatpush1.bf16.msra.mxu1 %v670_v17  ;;  %1807 = vmatprep.mubr.msk.bf16.mxu0 %vm720_vm0, %v2434_v18  ;;  %v421_v17 = vld [vmem:[%s2280_s9 + $0x128] sm:$0xff]  ;;  %v638_v28 = vpack.c.bf16 %v446_v16, %v438_v13  ;;  %v255_v63 = vld [vmem:[#allocation5 + $0xb8] sm:$0xff]  ;;  %v613_v2 = vpack.c.bf16 %v397_v57, %v389_v56  ;;  %v388_v3 = vld [vmem:[%s2280_s9 + $0x20] sm:$0xff] }
  0xa6   : > { %1821 = vmatprep.mubr.msk.bf16.mxu1 %vm720_vm0, %v2434_v18  ;;  %1111 = vmatprep.subr.bf16.mxu0 %v661_v22  ;;  %v423_v22 = vld [vmem:[%s2280_s9 + $0x138] sm:$0xff]  ;;  %v253_v62 = vld [vmem:[#allocation5 + $0xa8] sm:$0xff]  ;;  %v396_v4 = vld [vmem:[%s2280_s9 + $0x60] sm:$0xff]  ;;  %v323_v16 = vmul.f32 %v2381_v12, %v255_v63 }
  0xa7   : > { %1284 = vmatprep.subr.bf16.mxu1 %v663_v29  ;;  %v629_v29 = vpack.c.bf16 %v429_v19, %v421_v17  ;;  %v398_v10 = vld [vmem:[%s2280_s9 + $0x70] sm:$0xff]  ;;  %v597_v11 = vld [vmem:[%s2280_s9 + $0x6a8] sm:$0xff]  ;;  %v599_v17 = vld [vmem:[%s2280_s9 + $0x6b8] sm:$0xff]  ;;  %v612_v21 = vpack.c.bf16 %v396_v4, %v388_v3 }
  0xa8   : > { %1112 = vmatpush1.bf16.msra.mxu0 %v660_v32  ;;  %v422_v32 = vld [vmem:[%s2280_s9 + $0x130] sm:$0xff]  ;;  %v605_v13 = vld [vmem:[%s2280_s9 + $0x6e8] sm:$0xff]  ;;  %v607_v19 = vld [vmem:[%s2280_s9 + $0x6f8] sm:$0xff] }
  0xa9   : > { %1285 = vmatpush1.bf16.msra.mxu1 %v662_v35  ;;  %1113 = vmatprep.subr.bf16.mxu0 %v653_v36  ;;  %v631_v35 = vpack.c.bf16 %v431_v23, %v423_v22  ;;  %v430_v36 = vld [vmem:[%s2280_s9 + $0x170] sm:$0xff]  ;;  %v252_v22 = vld [vmem:[#allocation5 + $0xa0] sm:$0xff]  ;;  %v717_v24 = vpack.c.bf16 %v605_v13, %v597_v11  ;;  %v719_v30 = vpack.c.bf16 %v607_v19, %v599_v17  ;;  %v589_v33 = vld [vmem:[%s2280_s9 + $0x668] sm:$0xff] }
  0xaa   : > { %1286 = vmatprep.subr.bf16.mxu1 %v655_v38  ;;  %v413_v38 = vld [vmem:[%s2280_s9 + $0xe8] sm:$0xff]  ;;  %v630_v48 = vpack.c.bf16 %v430_v36, %v422_v32  ;;  %v596_v25 = vld [vmem:[%s2280_s9 + $0x6a0] sm:$0xff]  ;;  %v606_v31 = vld [vmem:[%s2280_s9 + $0x6f0] sm:$0xff] }
  0xab   : > { %806 = vmatmul.mubr.bf16.gmra.mxu0 %v2455_v43  ;;  %v621_v49 = vpack.c.bf16 %v413_v38, %v405_v37  ;;  %v581_v32 = vld [vmem:[%s2280_s9 + $0x628] sm:$0xff]  ;;  %v583_v36 = vld [vmem:[%s2280_s9 + $0x638] sm:$0xff]  ;;  %v588_v46 = vld [vmem:[%s2280_s9 + $0x660] sm:$0xff] }
  0xac   : > { %979 = vmatmul.mubr.bf16.gmra.mxu1 %v2455_v43  ;;  %1808 = vmatprep.mubr.msk.bf16.mxu0 %vm720_vm0, %v2460_v47  ;;  %v591_v37 = vld [vmem:[%s2280_s9 + $0x678] sm:$0xff]  ;;  %v257_v38 = vld [vmem:[#allocation5 + $0xc8] sm:$0xff]  ;;  %v566_v3 = vld [vmem:[%s2280_s9 + $0x5b0] sm:$0xff] }
  0xad   : > { %1822 = vmatprep.mubr.msk.bf16.mxu1 %vm720_vm0, %v2460_v47  ;;  %1114 = vmatpush1.bf16.msra.mxu0 %v652_v51  ;;  %v412_v51 = vld [vmem:[%s2280_s9 + $0xe0] sm:$0xff]  ;;  %v259_v39 = vld [vmem:[#allocation5 + $0xd8] sm:$0xff]  ;;  %v325_v56 = vmul.f32 %v2381_v12, %v257_v38  ;;  %v258_v11 = vld [vmem:[#allocation5 + $0xd0] sm:$0xff] }
  0xae   : > { %1287 = vmatpush1.bf16.msra.mxu1 %v654_v54  ;;  %1115 = vmatprep.subr.bf16.mxu0 %v645_v55  ;;  %v623_v54 = vpack.c.bf16 %v415_v44, %v407_v41  ;;  %v414_v55 = vld [vmem:[%s2280_s9 + $0xf0] sm:$0xff]  ;;  %v620_v0 = vpack.c.bf16 %v412_v51, %v404_v50  ;;  %v709_v44 = vpack.c.bf16 %v589_v33, %v581_v32  ;;  %v551_v13 = vld [vmem:[%s2280_s9 + $0x538] sm:$0xff]  ;;  %v533_v32 = vld [vmem:[%s2280_s9 + $0x4a8] sm:$0xff] }
  0xaf   : > { %1288 = vmatprep.subr.bf16.mxu1 %v647_v61  ;;  %v399_v61 = vld [vmem:[%s2280_s9 + $0x78] sm:$0xff]  ;;  %v622_v1 = vpack.c.bf16 %v414_v55, %v406_v52  ;;  %v711_v51 = vpack.c.bf16 %v591_v37, %v583_v36  ;;  %v590_v52 = vld [vmem:[%s2280_s9 + $0x670] sm:$0xff]  ;;  %v573_v55 = vld [vmem:[%s2280_s9 + $0x5e8] sm:$0xff]  ;;  %v327_v57 = vmul.f32 %v2381_v12, %v259_v39 }
  0xb0   : > { %v263_v17 = vld [vmem:[#allocation5 + $0xf8] sm:$0xff]  ;;  %v541_v33 = vld [vmem:[%s2280_s9 + $0x4e8] sm:$0xff] }
  0xb1   : > { %1116 = vmatpush1.bf16.msra.mxu0 %v644_v5  ;;  %v390_v5 = vld [vmem:[%s2280_s9 + $0x30] sm:$0xff]  ;;  %v331_v36 = vmul.f32 %v2381_v12, %v263_v17  ;;  %v535_v37 = vld [vmem:[%s2280_s9 + $0x4b8] sm:$0xff] }
  0xb2   : > { %1289 = vmatpush1.bf16.msra.mxu1 %v646_v7  ;;  %1117 = vmatprep.subr.bf16.mxu0 %v637_v9  ;;  %v318_v7 = vmul.f32 %v2409_v42, %v250_v59  ;;  %v615_v9 = vpack.c.bf16 %v399_v61, %v391_v60  ;;  %v614_v23 = vpack.c.bf16 %v398_v10, %v390_v5  ;;  %v567_v59 = vld [vmem:[%s2280_s9 + $0x5b8] sm:$0xff] }
  0xb3   : > { %816 = vmatmul.mubr.bf16.gmra.mxu0 %v2485_v14  ;;  %1290 = vmatprep.subr.bf16.mxu1 %v639_v15  ;;  %v321_v15 = vmul.f32 %v2381_v12, %v253_v62  ;;  %v575_v60 = vld [vmem:[%s2280_s9 + $0x5f8] sm:$0xff]  ;;  %v256_v62 = vld [vmem:[#allocation5 + $0xc0] sm:$0xff]  ;;  %v2580_v10 = vpack.c.bf16 %v327_v57, %v325_v56  ;;  %v262_v56 = vld [vmem:[#allocation5 + $0xf0] sm:$0xff] }
  0xb4   : > { %989 = vmatmul.mubr.bf16.gmra.mxu1 %v2485_v14  ;;  %1809 = vmatprep.mubr.msk.bf16.mxu0 %vm720_vm0, %v2490_v20  ;;  %v703_v5 = vpack.c.bf16 %v575_v60, %v567_v59  ;;  %v543_v38 = vld [vmem:[%s2280_s9 + $0x4f8] sm:$0xff]  ;;  %v265_v60 = vld [vmem:[#allocation5 + $0x108] sm:$0xff] }
  0xb5   : > { %1823 = vmatprep.mubr.msk.bf16.mxu1 %vm720_vm0, %v2490_v20  ;;  %1118 = vmatpush1.bf16.msra.mxu0 %v636_v26  ;;  %v604_v26 = vld [vmem:[%s2280_s9 + $0x6e0] sm:$0xff]  ;;  %v2550_v34 = vpack.c.bf16 %v323_v16, %v321_v15  ;;  %v559_v15 = vld [vmem:[%s2280_s9 + $0x578] sm:$0xff]  ;;  %v261_v16 = vld [vmem:[#allocation5 + $0xe8] sm:$0xff] }
  0xb6   : > { %1291 = vmatpush1.bf16.msra.mxu1 %v638_v28  ;;  %1119 = vmatprep.subr.bf16.mxu0 %v629_v29  ;;  %v598_v28 = vld [vmem:[%s2280_s9 + $0x6b0] sm:$0xff]  ;;  %v2545_v29 = vpack.c.bf16 %v318_v7, %v316_v6  ;;  %v716_v40 = vpack.c.bf16 %v604_v26, %v596_v25  ;;  %v549_v7 = vld [vmem:[%s2280_s9 + $0x528] sm:$0xff]  ;;  %v324_v26 = vmul.f32 %v2409_v42, %v256_v62  ;;  %v519_v57 = vld [vmem:[%s2280_s9 + $0x438] sm:$0xff] }
  0xb7   : > { %1292 = vmatprep.subr.bf16.mxu1 %v631_v35  ;;  %v254_v35 = vld [vmem:[#allocation5 + $0xb0] sm:$0xff]  ;;  %v718_v41 = vpack.c.bf16 %v606_v31, %v598_v28  ;;  %v326_v28 = vmul.f32 %v2409_v42, %v258_v11  ;;  %v527_v59 = vld [vmem:[%s2280_s9 + $0x478] sm:$0xff]  ;;  %v333_v11 = vmul.f32 %v2381_v12, %v265_v60 }
  0xb8   : > { %v322_v50 = vmul.f32 %v2409_v42, %v254_v35  ;;  %v574_v6 = vld [vmem:[%s2280_s9 + $0x5f0] sm:$0xff]  ;;  %v329_v35 = vmul.f32 %v2381_v12, %v261_v16 }
  0xb9   : > { %1120 = vmatpush1.bf16.msra.mxu0 %v628_v45  ;;  %v580_v45 = vld [vmem:[%s2280_s9 + $0x620] sm:$0xff]  ;;  %v550_v25 = vld [vmem:[%s2280_s9 + $0x530] sm:$0xff] }
  0xba   : > { %1293 = vmatpush1.bf16.msra.mxu1 %v630_v48  ;;  %1121 = vmatprep.subr.bf16.mxu0 %v621_v49  ;;  %v582_v48 = vld [vmem:[%s2280_s9 + $0x630] sm:$0xff]  ;;  %v320_v49 = vmul.f32 %v2409_v42, %v252_v22  ;;  %v708_v61 = vpack.c.bf16 %v588_v46, %v580_v45  ;;  %v532_v45 = vld [vmem:[%s2280_s9 + $0x4a0] sm:$0xff] }
  0xbb   : > { %826 = vmatmul.mubr.bf16.gmra.mxu0 %v2515_v53  ;;  %1294 = vmatprep.subr.bf16.mxu1 %v623_v54  ;;  %v565_v54 = vld [vmem:[%s2280_s9 + $0x5a8] sm:$0xff]  ;;  %v710_v63 = vpack.c.bf16 %v590_v52, %v582_v48  ;;  %v558_v31 = vld [vmem:[%s2280_s9 + $0x570] sm:$0xff]  ;;  %v540_v46 = vld [vmem:[%s2280_s9 + $0x4e0] sm:$0xff] }
  0xbc   : > { %999 = vmatmul.mubr.bf16.gmra.mxu1 %v2515_v53  ;;  %1810 = vmatprep.mubr.msk.bf16.mxu0 %vm720_vm0, %v2520_v58  ;;  %v2575_v4 = vpack.c.bf16 %v322_v50, %v320_v49  ;;  %v534_v48 = vld [vmem:[%s2280_s9 + $0x4b0] sm:$0xff]  ;;  %v2605_v49 = vpack.c.bf16 %v326_v28, %v324_v26  ;;  %v687_v50 = vpack.c.bf16 %v543_v38, %v535_v37  ;;  %v517_v52 = vld [vmem:[%s2280_s9 + $0x428] sm:$0xff]  ;;  %v275_v37 = vld [vmem:[#allocation5 + $0x158] sm:$0xff] }
  0xbd   : > { %1824 = vmatprep.mubr.msk.bf16.mxu1 %vm720_vm0, %v2520_v58  ;;  %1122 = vmatpush1.bf16.msra.mxu0 %v620_v0  ;;  %v701_v0 = vpack.c.bf16 %v573_v55, %v565_v54  ;;  %v525_v54 = vld [vmem:[%s2280_s9 + $0x468] sm:$0xff]  ;;  %v2610_v55 = vpack.c.bf16 %v331_v36, %v329_v35  ;;  %v684_v62 = vpack.c.bf16 %v540_v46, %v532_v45  ;;  %v270_v35 = vld [vmem:[#allocation5 + $0x130] sm:$0xff]  ;;  %v272_v46 = vld [vmem:[#allocation5 + $0x140] sm:$0xff] }
  0xbe   : > { %1295 = vmatpush1.bf16.msra.mxu1 %v622_v1  ;;  %1123 = vmatprep.subr.bf16.mxu0 %v613_v2  ;;  %v564_v1 = vld [vmem:[%s2280_s9 + $0x5a0] sm:$0xff]  ;;  %v273_v36 = vld [vmem:[#allocation5 + $0x148] sm:$0xff] }
  0xbf   : > { %1296 = vmatprep.subr.bf16.mxu1 %v615_v9  ;;  %v572_v2 = vld [vmem:[%s2280_s9 + $0x5e0] sm:$0xff]  ;;  %v557_v9 = vld [vmem:[%s2280_s9 + $0x568] sm:$0xff] }
  0xc0   : > { %v700_v19 = vpack.c.bf16 %v572_v2, %v564_v1  ;;  %v693_v22 = vpack.c.bf16 %v557_v9, %v549_v7  ;;  %v516_v1 = vld [vmem:[%s2280_s9 + $0x420] sm:$0xff]  ;;  %v518_v7 = vld [vmem:[%s2280_s9 + $0x430] sm:$0xff] }
  0xc1   : > { %1124 = vmatpush1.bf16.msra.mxu0 %v612_v21  ;;  %v702_v21 = vpack.c.bf16 %v574_v6, %v566_v3  ;;  %v524_v2 = vld [vmem:[%s2280_s9 + $0x460] sm:$0xff]  ;;  %v679_v6 = vpack.c.bf16 %v527_v59, %v519_v57  ;;  %v526_v9 = vld [vmem:[%s2280_s9 + $0x470] sm:$0xff] }
  0xc2   : > { %1297 = vmatpush1.bf16.msra.mxu1 %v614_v23  ;;  %1129 = vmatprep.subr.bf16.mxu0 %v717_v24  ;;  %v548_v23 = vld [vmem:[%s2280_s9 + $0x520] sm:$0xff]  ;;  %v678_v16 = vpack.c.bf16 %v526_v9, %v518_v7 }
  0xc3   : > { %836 = vmatmul.mubr.bf16.gmra.mxu0 %v2545_v29  ;;  %1302 = vmatprep.subr.bf16.mxu1 %v719_v30  ;;  %v556_v24 = vld [vmem:[%s2280_s9 + $0x560] sm:$0xff]  ;;  %v695_v30 = vpack.c.bf16 %v559_v15, %v551_v13  ;;  %v676_v15 = vpack.c.bf16 %v524_v2, %v516_v1 }
  0xc4   : > { %1009 = vmatmul.mubr.bf16.gmra.mxu1 %v2545_v29  ;;  %1811 = vmatprep.mubr.msk.bf16.mxu0 %vm720_vm0, %v2550_v34  ;;  %v692_v39 = vpack.c.bf16 %v556_v24, %v548_v23  ;;  %v269_v23 = vld [vmem:[#allocation5 + $0x128] sm:$0xff]  ;;  %v271_v24 = vld [vmem:[#allocation5 + $0x138] sm:$0xff]  ;;  %v280_v9 = vld [vmem:[#allocation5 + $0x180] sm:$0xff] }
  0xc5   : > { %1825 = vmatprep.mubr.msk.bf16.mxu1 %vm720_vm0, %v2550_v34  ;;  %1130 = vmatpush2.bf16.msra.mxu0 %v716_v40  ;;  %v260_v40 = vld [vmem:[#allocation5 + $0xe0] sm:$0xff]  ;;  %v337_v28 = vmul.f32 %v2381_v12, %v269_v23 }
  0xc6   : > { %1303 = vmatpush2.bf16.msra.mxu1 %v718_v41  ;;  %1131 = vmatprep.subr.bf16.mxu0 %v709_v44  ;;  %v694_v41 = vpack.c.bf16 %v558_v31, %v550_v25  ;;  %v685_v44 = vpack.c.bf16 %v541_v33, %v533_v32  ;;  %v328_v3 = vmul.f32 %v2409_v42, %v260_v40  ;;  %v268_v33 = vld [vmem:[#allocation5 + $0x120] sm:$0xff] }
  0xc7   : > { %1304 = vmatprep.subr.bf16.mxu1 %v711_v51  ;;  %v542_v51 = vld [vmem:[%s2280_s9 + $0x4f0] sm:$0xff]  ;;  %v336_v38 = vmul.f32 %v2409_v42, %v268_v33  ;;  %v341_v40 = vmul.f32 %v2381_v12, %v273_v36 }
  0xc9   : > { %1132 = vmatpush2.bf16.msra.mxu0 %v708_v61  ;;  %v267_v61 = vld [vmem:[#allocation5 + $0x118] sm:$0xff] }
  0xca   : > { %1305 = vmatpush2.bf16.msra.mxu1 %v710_v63  ;;  %1133 = vmatprep.subr.bf16.mxu0 %v701_v0  ;;  %v686_v63 = vpack.c.bf16 %v542_v51, %v534_v48  ;;  %v677_v0 = vpack.c.bf16 %v525_v54, %v517_v52  ;;  %v335_v13 = vmul.f32 %v2381_v12, %v267_v61  ;;  %v274_v48 = vld [vmem:[#allocation5 + $0x150] sm:$0xff]  ;;  %v279_v51 = vld [vmem:[#allocation5 + $0x178] sm:$0xff]  ;;  %v276_v61 = vld [vmem:[#allocation5 + $0x160] sm:$0xff] }
  0xcb   : > { %846 = vmatmul.mubr.bf16.gmra.mxu0 %v2575_v4  ;;  %1306 = vmatprep.subr.bf16.mxu1 %v703_v5  ;;  %v330_v5 = vmul.f32 %v2409_v42, %v262_v56  ;;  %v340_v52 = vmul.f32 %v2409_v42, %v272_v46  ;;  %v342_v54 = vmul.f32 %v2409_v42, %v274_v48 }
  0xcc   : > { %1019 = vmatmul.mubr.bf16.gmra.mxu1 %v2575_v4  ;;  %1812 = vmatprep.mubr.msk.bf16.mxu0 %vm720_vm0, %v2580_v10  ;;  %v347_v57 = vmul.f32 %v2381_v12, %v279_v51  ;;  %v344_v1 = vmul.f32 %v2409_v42, %v276_v61 }
  0xcd   : > { %1826 = vmatprep.mubr.msk.bf16.mxu1 %vm720_vm0, %v2580_v10  ;;  %1134 = vmatpush2.bf16.msra.mxu0 %v700_v19  ;;  %v2628_v17 = vpack.c.bf16 %v330_v5, %v328_v3  ;;  %v2630_v19 = vpack.c.bf16 %v335_v13, %v333_v11  ;;  %v2670_v59 = vpack.c.bf16 %v342_v54, %v340_v52  ;;  %v282_v11 = vld [vmem:[#allocation5 + $0x190] sm:$0xff]  ;;  %v285_v13 = vld [vmem:[#allocation5 + $0x1a8] sm:$0xff] }
  0xce   : > { %1307 = vmatpush2.bf16.msra.mxu1 %v702_v21  ;;  %1135 = vmatprep.subr.bf16.mxu0 %v693_v22  ;;  %v264_v21 = vld [vmem:[#allocation5 + $0x100] sm:$0xff]  ;;  %v266_v22 = vld [vmem:[#allocation5 + $0x110] sm:$0xff] }
  0xcf   : > { %1308 = vmatprep.subr.bf16.mxu1 %v695_v30  ;;  %v332_v25 = vmul.f32 %v2409_v42, %v264_v21  ;;  %v334_v26 = vmul.f32 %v2409_v42, %v266_v22  ;;  %v339_v30 = vmul.f32 %v2381_v12, %v271_v24  ;;  %v350_v21 = vmul.f32 %v2409_v42, %v282_v11 }
  0xd0   : > { %v353_v22 = vmul.f32 %v2381_v12, %v285_v13 }
  0xd1   : > { %1136 = vmatpush2.bf16.msra.mxu0 %v692_v39  ;;  %v2642_v31 = vpack.c.bf16 %v334_v26, %v332_v25  ;;  %v2644_v32 = vpack.c.bf16 %v339_v30, %v337_v28  ;;  %v338_v39 = vmul.f32 %v2409_v42, %v270_v35  ;;  %v284_v26 = vld [vmem:[#allocation5 + $0x1a0] sm:$0xff]  ;;  %v286_v28 = vld [vmem:[#allocation5 + $0x1b0] sm:$0xff] }
  0xd2   : > { %1309 = vmatpush2.bf16.msra.mxu1 %v694_v41  ;;  %1137 = vmatprep.subr.bf16.mxu0 %v685_v44  ;;  %v343_v41 = vmul.f32 %v2381_v12, %v275_v37  ;;  %v352_v30 = vmul.f32 %v2409_v42, %v284_v26  ;;  %v354_v33 = vmul.f32 %v2409_v42, %v286_v28 }
  0xd3   : > { %856 = vmatmul.mubr.bf16.gmra.mxu0 %v2605_v49  ;;  %1310 = vmatprep.subr.bf16.mxu1 %v687_v50  ;;  %v2656_v44 = vpack.c.bf16 %v338_v39, %v336_v38  ;;  %v277_v50 = vld [vmem:[#allocation5 + $0x168] sm:$0xff] }
  0xd4   : > { %1029 = vmatmul.mubr.bf16.gmra.mxu1 %v2605_v49  ;;  %1813 = vmatprep.mubr.msk.bf16.mxu0 %vm720_vm0, %v2610_v55  ;;  %v2658_v45 = vpack.c.bf16 %v343_v41, %v341_v40  ;;  %v345_v56 = vmul.f32 %v2381_v12, %v277_v50 }
  0xd5   : > { %1827 = vmatprep.mubr.msk.bf16.mxu1 %vm720_vm0, %v2610_v55  ;;  %1138 = vmatpush2.bf16.msra.mxu0 %v684_v62  ;;  %v278_v62 = vld [vmem:[#allocation5 + $0x170] sm:$0xff] }
  0xd6   : > { %1311 = vmatpush2.bf16.msra.mxu1 %v686_v63  ;;  %1139 = vmatprep.subr.bf16.mxu0 %v677_v0  ;;  %v2672_v60 = vpack.c.bf16 %v347_v57, %v345_v56  ;;  %v281_v63 = vld [vmem:[#allocation5 + $0x188] sm:$0xff]  ;;  %v283_v0 = vld [vmem:[#allocation5 + $0x198] sm:$0xff]  ;;  %v346_v2 = vmul.f32 %v2409_v42, %v278_v62 }
  0xd7   : > { %1312 = vmatprep.subr.bf16.mxu1 %v679_v6  ;;  %v349_v3 = vmul.f32 %v2381_v12, %v281_v63  ;;  %v351_v5 = vmul.f32 %v2381_v12, %v283_v0 }
  0xd8   : > { %v2684_v6 = vpack.c.bf16 %v346_v2, %v344_v1 }
  0xd9   : > { %1140 = vmatpush2.bf16.msra.mxu0 %v676_v15  ;;  %v2686_v7 = vpack.c.bf16 %v351_v5, %v349_v3  ;;  %v287_v15 = vld [vmem:[#allocation5 + $0x1b8] sm:$0xff] }
  0xda   : > { %1313 = vmatpush2.bf16.msra.mxu1 %v678_v16  ;;  %v348_v16 = vmul.f32 %v2409_v42, %v280_v9  ;;  %v355_v23 = vmul.f32 %v2381_v12, %v287_v15  ;;  %v2710_v12 = vpack.c.bf16 %v354_v33, %v352_v30 }
  0xdb   : > { %866 = vmatmul.mubr.bf16.gmra.mxu0 %v2628_v17 }
  0xdc   : > { %1039 = vmatmul.mubr.bf16.gmra.mxu1 %v2628_v17  ;;  %1814 = vmatprep.mubr.msk.bf16.mxu0 %vm720_vm0, %v2630_v19  ;;  %v2698_v24 = vpack.c.bf16 %v350_v21, %v348_v16  ;;  %v2700_v25 = vpack.c.bf16 %v355_v23, %v353_v22 }
  0xdd   : > { %1828 = vmatprep.mubr.msk.bf16.mxu1 %vm720_vm0, %v2630_v19 }
  0xe3   : > { %876 = vmatmul.mubr.bf16.gmra.mxu0 %v2642_v31 }
  0xe4   : > { %1049 = vmatmul.mubr.bf16.gmra.mxu1 %v2642_v31  ;;  %1815 = vmatprep.mubr.msk.bf16.mxu0 %vm720_vm0, %v2644_v32 }
  0xe5   : > { %1829 = vmatprep.mubr.msk.bf16.mxu1 %vm720_vm0, %v2644_v32 }
  0xeb   : > { %886 = vmatmul.mubr.bf16.gmra.mxu0 %v2656_v44 }
  0xec   : > { %1059 = vmatmul.mubr.bf16.gmra.mxu1 %v2656_v44  ;;  %1816 = vmatprep.mubr.msk.bf16.mxu0 %vm720_vm0, %v2658_v45 }
  0xed   : > { %1830 = vmatprep.mubr.msk.bf16.mxu1 %vm720_vm0, %v2658_v45 }
  0xf3   : > { %896 = vmatmul.mubr.bf16.gmra.mxu0 %v2670_v59 }
  0xf4   : > { %1069 = vmatmul.mubr.bf16.gmra.mxu1 %v2670_v59  ;;  %1817 = vmatprep.mubr.msk.bf16.mxu0 %vm720_vm0, %v2672_v60 }
  0xf5   : > { %1831 = vmatprep.mubr.msk.bf16.mxu1 %vm720_vm0, %v2672_v60 }
  0xfb   : > { %906 = vmatmul.mubr.bf16.gmra.mxu0 %v2684_v6 }
  0xfc   : > { %1079 = vmatmul.mubr.bf16.gmra.mxu1 %v2684_v6  ;;  %1818 = vmatprep.mubr.msk.bf16.mxu0 %vm720_vm0, %v2686_v7 }
  0xfd   : > { %1832 = vmatprep.mubr.msk.bf16.mxu1 %vm720_vm0, %v2686_v7 }
 0x103   : > { %916 = vmatmul.mubr.bf16.gmra.mxu0 %v2698_v24 }
 0x104   : > { %1089 = vmatmul.mubr.bf16.gmra.mxu1 %v2698_v24  ;;  %1819 = vmatprep.mubr.msk.bf16.mxu0 %vm720_vm0, %v2700_v25 }
 0x105   : > { %1833 = vmatprep.mubr.msk.bf16.mxu1 %vm720_vm0, %v2700_v25 }
 0x10b   : > { %926 = vmatmul.mubr.bf16.gmra.mxu0 %v2710_v12 }
 0x10c   : > { %1099 = vmatmul.mubr.bf16.gmra.mxu1 %v2710_v12  ;;  %1834 = vmatprep.mubr.msk.bf16.mxu0 %vm720_vm0, %v2393_v27 }
 0x10d   : > { %1848 = vmatprep.mubr.msk.bf16.mxu1 %vm720_vm0, %v2393_v27 }
 0x113   : > { %1142 = vmatmul.mubr.bf16.vlgmr.msra.gmra.mxu0 %v2426_v8 }
 0x114   : > { %1315 = vmatmul.mubr.bf16.vlgmr.msra.gmra.mxu1 %v2426_v8  ;;  %1835 = vmatprep.mubr.msk.bf16.mxu0 %vm720_vm0, %v2434_v18 }
 0x115   : > { %1849 = vmatprep.mubr.msk.bf16.mxu1 %vm720_vm0, %v2434_v18 }
 0x11b   : > { %1152 = vmatmul.mubr.bf16.gmra.mxu0 %v2455_v43 }
 0x11c   : > { %1325 = vmatmul.mubr.bf16.gmra.mxu1 %v2455_v43  ;;  %1836 = vmatprep.mubr.msk.bf16.mxu0 %vm720_vm0, %v2460_v47 }
 0x11d   : > { %1850 = vmatprep.mubr.msk.bf16.mxu1 %vm720_vm0, %v2460_v47 }
 0x123   : > { %1162 = vmatmul.mubr.bf16.gmra.mxu0 %v2485_v14 }
 0x124   : > { %1335 = vmatmul.mubr.bf16.gmra.mxu1 %v2485_v14  ;;  %1837 = vmatprep.mubr.msk.bf16.mxu0 %vm720_vm0, %v2490_v20 }
 0x125   : > { %1851 = vmatprep.mubr.msk.bf16.mxu1 %vm720_vm0, %v2490_v20 }
 0x12b   : > { %1172 = vmatmul.mubr.bf16.gmra.mxu0 %v2515_v53 }
 0x12c   : > { %1345 = vmatmul.mubr.bf16.gmra.mxu1 %v2515_v53  ;;  %1838 = vmatprep.mubr.msk.bf16.mxu0 %vm720_vm0, %v2520_v58 }
 0x12d   : > { %1852 = vmatprep.mubr.msk.bf16.mxu1 %vm720_vm0, %v2520_v58 }
 0x133   : > { %1182 = vmatmul.mubr.bf16.gmra.mxu0 %v2545_v29 }
 0x134   : > { %1355 = vmatmul.mubr.bf16.gmra.mxu1 %v2545_v29  ;;  %1839 = vmatprep.mubr.msk.bf16.mxu0 %vm720_vm0, %v2550_v34 }
 0x135   : > { %1853 = vmatprep.mubr.msk.bf16.mxu1 %vm720_vm0, %v2550_v34 }
 0x13b   : > { %1192 = vmatmul.mubr.bf16.gmra.mxu0 %v2575_v4 }
 0x13c   : > { %1365 = vmatmul.mubr.bf16.gmra.mxu1 %v2575_v4  ;;  %1840 = vmatprep.mubr.msk.bf16.mxu0 %vm720_vm0, %v2580_v10 }
 0x13d   : > { %1854 = vmatprep.mubr.msk.bf16.mxu1 %vm720_vm0, %v2580_v10 }
 0x143   : > { %1202 = vmatmul.mubr.bf16.gmra.mxu0 %v2605_v49 }
 0x144   : > { %1375 = vmatmul.mubr.bf16.gmra.mxu1 %v2605_v49  ;;  %1841 = vmatprep.mubr.msk.bf16.mxu0 %vm720_vm0, %v2610_v55 }
 0x145   : > { %1855 = vmatprep.mubr.msk.bf16.mxu1 %vm720_vm0, %v2610_v55 }
 0x14b   : > { %1212 = vmatmul.mubr.bf16.gmra.mxu0 %v2628_v17 }
 0x14c   : > { %1385 = vmatmul.mubr.bf16.gmra.mxu1 %v2628_v17  ;;  %1842 = vmatprep.mubr.msk.bf16.mxu0 %vm720_vm0, %v2630_v19 }
 0x14d   : > { %1856 = vmatprep.mubr.msk.bf16.mxu1 %vm720_vm0, %v2630_v19 }
 0x153   : > { %1222 = vmatmul.mubr.bf16.gmra.mxu0 %v2642_v31 }
 0x154   : > { %1395 = vmatmul.mubr.bf16.gmra.mxu1 %v2642_v31  ;;  %1843 = vmatprep.mubr.msk.bf16.mxu0 %vm720_vm0, %v2644_v32 }
 0x155   : > { %1857 = vmatprep.mubr.msk.bf16.mxu1 %vm720_vm0, %v2644_v32 }
 0x15b   : > { %1232 = vmatmul.mubr.bf16.gmra.mxu0 %v2656_v44 }
 0x15c   : > { %1405 = vmatmul.mubr.bf16.gmra.mxu1 %v2656_v44  ;;  %1844 = vmatprep.mubr.msk.bf16.mxu0 %vm720_vm0, %v2658_v45 }
 0x15d   : > { %1858 = vmatprep.mubr.msk.bf16.mxu1 %vm720_vm0, %v2658_v45 }
 0x163   : > { %v797_v27 = vpop.f32.mrf.mxu0  ;;  %1242 = vmatmul.mubr.bf16.gmra.mxu0 %v2670_v59 }
 0x164   : > { %1455 = vst [vmem:[%s2780_s23] sm:$0xff] %v797_v27  ;;  %v970_v42 = vpop.f32.mrf.mxu1  ;;  %1415 = vmatmul.mubr.bf16.gmra.mxu1 %v2670_v59  ;;  %1845 = vmatprep.mubr.msk.bf16.mxu0 %vm720_vm0, %v2672_v60 }
 0x165   : > { %1457 = vst [vmem:[%s2780_s23 + $0x10] sm:$0xff] %v970_v42  ;;  %v799_v8 = vpop.f32.mrf.mxu0  ;;  %1859 = vmatprep.mubr.msk.bf16.mxu1 %vm720_vm0, %v2672_v60 }
 0x166   : > { %1456 = vst [vmem:[%s2780_s23 + $0x8] sm:$0xff] %v799_v8  ;;  %v972_v18 = vpop.f32.mrf.mxu1 }
 0x167   : > { %1458 = vst [vmem:[%s2780_s23 + $0x18] sm:$0xff] %v972_v18  ;;  %v801_v43 = vpop.f32.mrf.mxu0 }
 0x168   : > { %1463 = vst [vmem:[%s2780_s23 + $0x40] sm:$0xff] %v801_v43  ;;  %v974_v47 = vpop.f32.mrf.mxu1 }
 0x169   : > { %1465 = vst [vmem:[%s2780_s23 + $0x50] sm:$0xff] %v974_v47  ;;  %v803_v14 = vpop.f32.mrf.mxu0 }
 0x16a   : > { %1464 = vst [vmem:[%s2780_s23 + $0x48] sm:$0xff] %v803_v14  ;;  %v976_v20 = vpop.f32.mrf.mxu1 }
 0x16b   : > { %1466 = vst [vmem:[%s2780_s23 + $0x58] sm:$0xff] %v976_v20  ;;  %v807_v53 = vpop.f32.mrf.mxu0  ;;  %1252 = vmatmul.mubr.bf16.gmra.mxu0 %v2684_v6 }
 0x16c   : > { %1471 = vst [vmem:[%s2780_s23 + $0x80] sm:$0xff] %v807_v53  ;;  %v980_v58 = vpop.f32.mrf.mxu1  ;;  %1425 = vmatmul.mubr.bf16.gmra.mxu1 %v2684_v6  ;;  %1846 = vmatprep.mubr.msk.bf16.mxu0 %vm720_vm0, %v2686_v7 }
 0x16d   : > { %1473 = vst [vmem:[%s2780_s23 + $0x90] sm:$0xff] %v980_v58  ;;  %v809_v29 = vpop.f32.mrf.mxu0  ;;  %1860 = vmatprep.mubr.msk.bf16.mxu1 %vm720_vm0, %v2686_v7 }
 0x16e   : > { %1472 = vst [vmem:[%s2780_s23 + $0x88] sm:$0xff] %v809_v29  ;;  %v982_v34 = vpop.f32.mrf.mxu1 }
 0x16f   : > { %1474 = vst [vmem:[%s2780_s23 + $0x98] sm:$0xff] %v982_v34  ;;  %v811_v4 = vpop.f32.mrf.mxu0 }
 0x170   : > { %1479 = vst [vmem:[%s2780_s23 + $0xc0] sm:$0xff] %v811_v4  ;;  %v984_v10 = vpop.f32.mrf.mxu1 }
 0x171   : > { %1481 = vst [vmem:[%s2780_s23 + $0xd0] sm:$0xff] %v984_v10  ;;  %v813_v49 = vpop.f32.mrf.mxu0 }
 0x172   : > { %1480 = vst [vmem:[%s2780_s23 + $0xc8] sm:$0xff] %v813_v49  ;;  %v986_v55 = vpop.f32.mrf.mxu1 }
 0x173   : > { %1482 = vst [vmem:[%s2780_s23 + $0xd8] sm:$0xff] %v986_v55  ;;  %v817_v17 = vpop.f32.mrf.mxu0  ;;  %1262 = vmatmul.mubr.bf16.gmra.mxu0 %v2698_v24 }
 0x174   : > { %1487 = vst [vmem:[%s2780_s23 + $0x100] sm:$0xff] %v817_v17  ;;  %v990_v19 = vpop.f32.mrf.mxu1  ;;  %1435 = vmatmul.mubr.bf16.gmra.mxu1 %v2698_v24  ;;  %1847 = vmatprep.mubr.msk.bf16.mxu0 %vm720_vm0, %v2700_v25 }
 0x175   : > { %1489 = vst [vmem:[%s2780_s23 + $0x110] sm:$0xff] %v990_v19  ;;  %v819_v31 = vpop.f32.mrf.mxu0  ;;  %1861 = vmatprep.mubr.msk.bf16.mxu1 %vm720_vm0, %v2700_v25 }
 0x176   : > { %1488 = vst [vmem:[%s2780_s23 + $0x108] sm:$0xff] %v819_v31  ;;  %v992_v32 = vpop.f32.mrf.mxu1 }
 0x177   : > { %1490 = vst [vmem:[%s2780_s23 + $0x118] sm:$0xff] %v992_v32  ;;  %v821_v35 = vpop.f32.mrf.mxu0 }
 0x178   : > { %1495 = vst [vmem:[%s2780_s23 + $0x140] sm:$0xff] %v821_v35  ;;  %v994_v36 = vpop.f32.mrf.mxu1 }
 0x179   : > { %1497 = vst [vmem:[%s2780_s23 + $0x150] sm:$0xff] %v994_v36  ;;  %v823_v37 = vpop.f32.mrf.mxu0 }
 0x17a   : > { %1496 = vst [vmem:[%s2780_s23 + $0x148] sm:$0xff] %v823_v37  ;;  %v996_v38 = vpop.f32.mrf.mxu1 }
 0x17b   : > { %1498 = vst [vmem:[%s2780_s23 + $0x158] sm:$0xff] %v996_v38  ;;  %v827_v39 = vpop.f32.mrf.mxu0  ;;  %1272 = vmatmul.mubr.bf16.gmra.mxu0 %v2710_v12 }
 0x17c   : > { %1503 = vst [vmem:[%s2780_s23 + $0x180] sm:$0xff] %v827_v39  ;;  %v1000_v40 = vpop.f32.mrf.mxu1  ;;  %1445 = vmatmul.mubr.bf16.gmra.mxu1 %v2710_v12 }
 0x17d   : > { %1505 = vst [vmem:[%s2780_s23 + $0x190] sm:$0xff] %v1000_v40  ;;  %v829_v41 = vpop.f32.mrf.mxu0 }
 0x17e   : > { %1504 = vst [vmem:[%s2780_s23 + $0x188] sm:$0xff] %v829_v41  ;;  %v1002_v44 = vpop.f32.mrf.mxu1 }
 0x17f   : > { %1506 = vst [vmem:[%s2780_s23 + $0x198] sm:$0xff] %v1002_v44  ;;  %v831_v45 = vpop.f32.mrf.mxu0 }
 0x180   : > { %1511 = vst [vmem:[%s2780_s23 + $0x1c0] sm:$0xff] %v831_v45  ;;  %v1004_v46 = vpop.f32.mrf.mxu1 }
 0x181   : > { %1513 = vst [vmem:[%s2780_s23 + $0x1d0] sm:$0xff] %v1004_v46  ;;  %v833_v48 = vpop.f32.mrf.mxu0 }
 0x182   : > { %1512 = vst [vmem:[%s2780_s23 + $0x1c8] sm:$0xff] %v833_v48  ;;  %v1006_v50 = vpop.f32.mrf.mxu1 }
 0x183   : > { %1514 = vst [vmem:[%s2780_s23 + $0x1d8] sm:$0xff] %v1006_v50  ;;  %v837_v51 = vpop.f32.mrf.mxu0 }
 0x184   : > { %1519 = vst [vmem:[%s2780_s23 + $0x200] sm:$0xff] %v837_v51  ;;  %v1010_v52 = vpop.f32.mrf.mxu1 }
 0x185   : > { %1521 = vst [vmem:[%s2780_s23 + $0x210] sm:$0xff] %v1010_v52  ;;  %v839_v54 = vpop.f32.mrf.mxu0 }
 0x186   : > { %1520 = vst [vmem:[%s2780_s23 + $0x208] sm:$0xff] %v839_v54  ;;  %v1012_v56 = vpop.f32.mrf.mxu1 }
 0x187   : > { %1522 = vst [vmem:[%s2780_s23 + $0x218] sm:$0xff] %v1012_v56  ;;  %v841_v57 = vpop.f32.mrf.mxu0 }
 0x188   : > { %1527 = vst [vmem:[%s2780_s23 + $0x240] sm:$0xff] %v841_v57  ;;  %v1014_v59 = vpop.f32.mrf.mxu1 }
 0x189   : > { %1529 = vst [vmem:[%s2780_s23 + $0x250] sm:$0xff] %v1014_v59  ;;  %v843_v60 = vpop.f32.mrf.mxu0 }
 0x18a   : > { %1528 = vst [vmem:[%s2780_s23 + $0x248] sm:$0xff] %v843_v60  ;;  %v1016_v61 = vpop.f32.mrf.mxu1 }
 0x18b   : > { %1530 = vst [vmem:[%s2780_s23 + $0x258] sm:$0xff] %v1016_v61  ;;  %v847_v62 = vpop.f32.mrf.mxu0 }
 0x18c   : > { %1535 = vst [vmem:[%s2780_s23 + $0x280] sm:$0xff] %v847_v62  ;;  %v1020_v63 = vpop.f32.mrf.mxu1 }
 0x18d   : > { %1537 = vst [vmem:[%s2780_s23 + $0x290] sm:$0xff] %v1020_v63  ;;  %v849_v0 = vpop.f32.mrf.mxu0 }
 0x18e   : > { %1536 = vst [vmem:[%s2780_s23 + $0x288] sm:$0xff] %v849_v0  ;;  %v1022_v1 = vpop.f32.mrf.mxu1 }
 0x18f   : > { %1538 = vst [vmem:[%s2780_s23 + $0x298] sm:$0xff] %v1022_v1  ;;  %v851_v2 = vpop.f32.mrf.mxu0 }
 0x190   : > { %1543 = vst [vmem:[%s2780_s23 + $0x2c0] sm:$0xff] %v851_v2  ;;  %v1024_v3 = vpop.f32.mrf.mxu1 }
 0x191   : > { %1545 = vst [vmem:[%s2780_s23 + $0x2d0] sm:$0xff] %v1024_v3  ;;  %v853_v5 = vpop.f32.mrf.mxu0 }
 0x192   : > { %1544 = vst [vmem:[%s2780_s23 + $0x2c8] sm:$0xff] %v853_v5  ;;  %v1026_v6 = vpop.f32.mrf.mxu1 }
 0x193   : > { %1546 = vst [vmem:[%s2780_s23 + $0x2d8] sm:$0xff] %v1026_v6  ;;  %v857_v7 = vpop.f32.mrf.mxu0 }
 0x194   : > { %1551 = vst [vmem:[%s2780_s23 + $0x300] sm:$0xff] %v857_v7  ;;  %v1030_v9 = vpop.f32.mrf.mxu1 }
 0x195   : > { %1553 = vst [vmem:[%s2780_s23 + $0x310] sm:$0xff] %v1030_v9  ;;  %v859_v11 = vpop.f32.mrf.mxu0 }
 0x196   : > { %1552 = vst [vmem:[%s2780_s23 + $0x308] sm:$0xff] %v859_v11  ;;  %v1032_v13 = vpop.f32.mrf.mxu1 }
 0x197   : > { %1554 = vst [vmem:[%s2780_s23 + $0x318] sm:$0xff] %v1032_v13  ;;  %v861_v15 = vpop.f32.mrf.mxu0 }
 0x198   : > { %1559 = vst [vmem:[%s2780_s23 + $0x340] sm:$0xff] %v861_v15  ;;  %v1034_v16 = vpop.f32.mrf.mxu1 }
 0x199   : > { %1561 = vst [vmem:[%s2780_s23 + $0x350] sm:$0xff] %v1034_v16  ;;  %v863_v21 = vpop.f32.mrf.mxu0 }
 0x19a   : > { %1560 = vst [vmem:[%s2780_s23 + $0x348] sm:$0xff] %v863_v21  ;;  %v1036_v22 = vpop.f32.mrf.mxu1 }
 0x19b   : > { %1562 = vst [vmem:[%s2780_s23 + $0x358] sm:$0xff] %v1036_v22  ;;  %v867_v23 = vpop.f32.mrf.mxu0 }
 0x19c   : > { %1567 = vst [vmem:[%s2780_s23 + $0x380] sm:$0xff] %v867_v23  ;;  %v1040_v24 = vpop.f32.mrf.mxu1 }
 0x19d   : > { %1569 = vst [vmem:[%s2780_s23 + $0x390] sm:$0xff] %v1040_v24  ;;  %v869_v25 = vpop.f32.mrf.mxu0 }
 0x19e   : > { %1568 = vst [vmem:[%s2780_s23 + $0x388] sm:$0xff] %v869_v25  ;;  %v1042_v26 = vpop.f32.mrf.mxu1 }
 0x19f   : > { %1570 = vst [vmem:[%s2780_s23 + $0x398] sm:$0xff] %v1042_v26  ;;  %v871_v28 = vpop.f32.mrf.mxu0 }
 0x1a0   : > { %1575 = vst [vmem:[%s2780_s23 + $0x3c0] sm:$0xff] %v871_v28  ;;  %v1044_v30 = vpop.f32.mrf.mxu1 }
 0x1a1   : > { %1577 = vst [vmem:[%s2780_s23 + $0x3d0] sm:$0xff] %v1044_v30  ;;  %v873_v33 = vpop.f32.mrf.mxu0 }
 0x1a2   : > { %1576 = vst [vmem:[%s2780_s23 + $0x3c8] sm:$0xff] %v873_v33  ;;  %v1046_v12 = vpop.f32.mrf.mxu1 }
 0x1a3   : > { %1578 = vst [vmem:[%s2780_s23 + $0x3d8] sm:$0xff] %v1046_v12  ;;  %v877_v27 = vpop.f32.mrf.mxu0 }
 0x1a4   : > { %1583 = vst [vmem:[%s2780_s23 + $0x400] sm:$0xff] %v877_v27  ;;  %v1050_v42 = vpop.f32.mrf.mxu1 }
 0x1a5   : > { %1585 = vst [vmem:[%s2780_s23 + $0x410] sm:$0xff] %v1050_v42  ;;  %v879_v8 = vpop.f32.mrf.mxu0 }
 0x1a6   : > { %1584 = vst [vmem:[%s2780_s23 + $0x408] sm:$0xff] %v879_v8  ;;  %v1052_v18 = vpop.f32.mrf.mxu1 }
 0x1a7   : > { %1586 = vst [vmem:[%s2780_s23 + $0x418] sm:$0xff] %v1052_v18  ;;  %v881_v43 = vpop.f32.mrf.mxu0 }
 0x1a8   : > { %1591 = vst [vmem:[%s2780_s23 + $0x440] sm:$0xff] %v881_v43  ;;  %v1054_v47 = vpop.f32.mrf.mxu1 }
 0x1a9   : > { %1593 = vst [vmem:[%s2780_s23 + $0x450] sm:$0xff] %v1054_v47  ;;  %v883_v14 = vpop.f32.mrf.mxu0 }
 0x1aa   : > { %1592 = vst [vmem:[%s2780_s23 + $0x448] sm:$0xff] %v883_v14  ;;  %v1056_v20 = vpop.f32.mrf.mxu1 }
 0x1ab   : > { %1594 = vst [vmem:[%s2780_s23 + $0x458] sm:$0xff] %v1056_v20  ;;  %v887_v53 = vpop.f32.mrf.mxu0 }
 0x1ac   : > { %1599 = vst [vmem:[%s2780_s23 + $0x480] sm:$0xff] %v887_v53  ;;  %v1060_v58 = vpop.f32.mrf.mxu1 }
 0x1ad   : > { %1601 = vst [vmem:[%s2780_s23 + $0x490] sm:$0xff] %v1060_v58  ;;  %v889_v29 = vpop.f32.mrf.mxu0 }
 0x1ae   : > { %1600 = vst [vmem:[%s2780_s23 + $0x488] sm:$0xff] %v889_v29  ;;  %v1062_v34 = vpop.f32.mrf.mxu1 }
 0x1af   : > { %1602 = vst [vmem:[%s2780_s23 + $0x498] sm:$0xff] %v1062_v34  ;;  %v891_v4 = vpop.f32.mrf.mxu0 }
 0x1b0   : > { %1607 = vst [vmem:[%s2780_s23 + $0x4c0] sm:$0xff] %v891_v4  ;;  %v1064_v10 = vpop.f32.mrf.mxu1 }
 0x1b1   : > { %1609 = vst [vmem:[%s2780_s23 + $0x4d0] sm:$0xff] %v1064_v10  ;;  %v893_v49 = vpop.f32.mrf.mxu0 }
 0x1b2   : > { %1608 = vst [vmem:[%s2780_s23 + $0x4c8] sm:$0xff] %v893_v49  ;;  %v1066_v55 = vpop.f32.mrf.mxu1 }
 0x1b3   : > { %1610 = vst [vmem:[%s2780_s23 + $0x4d8] sm:$0xff] %v1066_v55  ;;  %v897_v17 = vpop.f32.mrf.mxu0 }
 0x1b4   : > { %1615 = vst [vmem:[%s2780_s23 + $0x500] sm:$0xff] %v897_v17  ;;  %v1070_v19 = vpop.f32.mrf.mxu1 }
 0x1b5   : > { %1617 = vst [vmem:[%s2780_s23 + $0x510] sm:$0xff] %v1070_v19  ;;  %v899_v31 = vpop.f32.mrf.mxu0 }
 0x1b6   : > { %1616 = vst [vmem:[%s2780_s23 + $0x508] sm:$0xff] %v899_v31  ;;  %v1072_v32 = vpop.f32.mrf.mxu1 }
 0x1b7   : > { %1618 = vst [vmem:[%s2780_s23 + $0x518] sm:$0xff] %v1072_v32  ;;  %v901_v35 = vpop.f32.mrf.mxu0 }
 0x1b8   : > { %1623 = vst [vmem:[%s2780_s23 + $0x540] sm:$0xff] %v901_v35  ;;  %v1074_v36 = vpop.f32.mrf.mxu1 }
 0x1b9   : > { %1625 = vst [vmem:[%s2780_s23 + $0x550] sm:$0xff] %v1074_v36  ;;  %v903_v37 = vpop.f32.mrf.mxu0 }
 0x1ba   : > { %1624 = vst [vmem:[%s2780_s23 + $0x548] sm:$0xff] %v903_v37  ;;  %v1076_v38 = vpop.f32.mrf.mxu1 }
 0x1bb   : > { %1626 = vst [vmem:[%s2780_s23 + $0x558] sm:$0xff] %v1076_v38  ;;  %v907_v39 = vpop.f32.mrf.mxu0 }
 0x1bc   : > { %1631 = vst [vmem:[%s2780_s23 + $0x580] sm:$0xff] %v907_v39  ;;  %v1080_v40 = vpop.f32.mrf.mxu1 }
 0x1bd   : > { %1633 = vst [vmem:[%s2780_s23 + $0x590] sm:$0xff] %v1080_v40  ;;  %v909_v41 = vpop.f32.mrf.mxu0 }
 0x1be   : > { %1632 = vst [vmem:[%s2780_s23 + $0x588] sm:$0xff] %v909_v41  ;;  %v1082_v44 = vpop.f32.mrf.mxu1 }
 0x1bf   : > { %1634 = vst [vmem:[%s2780_s23 + $0x598] sm:$0xff] %v1082_v44  ;;  %v911_v45 = vpop.f32.mrf.mxu0 }
 0x1c0   : > { %1639 = vst [vmem:[%s2780_s23 + $0x5c0] sm:$0xff] %v911_v45  ;;  %v1084_v46 = vpop.f32.mrf.mxu1 }
 0x1c1   : > { %1641 = vst [vmem:[%s2780_s23 + $0x5d0] sm:$0xff] %v1084_v46  ;;  %v913_v48 = vpop.f32.mrf.mxu0 }
 0x1c2   : > { %1640 = vst [vmem:[%s2780_s23 + $0x5c8] sm:$0xff] %v913_v48  ;;  %v1086_v50 = vpop.f32.mrf.mxu1 }
 0x1c3   : > { %1642 = vst [vmem:[%s2780_s23 + $0x5d8] sm:$0xff] %v1086_v50  ;;  %v917_v51 = vpop.f32.mrf.mxu0 }
 0x1c4   : > { %1647 = vst [vmem:[%s2780_s23 + $0x600] sm:$0xff] %v917_v51  ;;  %v1090_v52 = vpop.f32.mrf.mxu1 }
 0x1c5   : > { %1649 = vst [vmem:[%s2780_s23 + $0x610] sm:$0xff] %v1090_v52  ;;  %v919_v54 = vpop.f32.mrf.mxu0 }
 0x1c6   : > { %1648 = vst [vmem:[%s2780_s23 + $0x608] sm:$0xff] %v919_v54  ;;  %v1092_v56 = vpop.f32.mrf.mxu1 }
 0x1c7   : > { %1650 = vst [vmem:[%s2780_s23 + $0x618] sm:$0xff] %v1092_v56  ;;  %v921_v57 = vpop.f32.mrf.mxu0 }
 0x1c8   : > { %1655 = vst [vmem:[%s2780_s23 + $0x640] sm:$0xff] %v921_v57  ;;  %v1094_v59 = vpop.f32.mrf.mxu1 }
 0x1c9   : > { %1657 = vst [vmem:[%s2780_s23 + $0x650] sm:$0xff] %v1094_v59  ;;  %v923_v60 = vpop.f32.mrf.mxu0 }
 0x1ca   : > { %1656 = vst [vmem:[%s2780_s23 + $0x648] sm:$0xff] %v923_v60  ;;  %v1096_v61 = vpop.f32.mrf.mxu1 }
 0x1cb   : > { %1658 = vst [vmem:[%s2780_s23 + $0x658] sm:$0xff] %v1096_v61  ;;  %v927_v62 = vpop.f32.mrf.mxu0 }
 0x1cc   : > { %1663 = vst [vmem:[%s2780_s23 + $0x680] sm:$0xff] %v927_v62  ;;  %v1100_v63 = vpop.f32.mrf.mxu1 }
 0x1cd   : > { %1665 = vst [vmem:[%s2780_s23 + $0x690] sm:$0xff] %v1100_v63  ;;  %v929_v0 = vpop.f32.mrf.mxu0 }
 0x1ce   : > { %1664 = vst [vmem:[%s2780_s23 + $0x688] sm:$0xff] %v929_v0  ;;  %v1102_v1 = vpop.f32.mrf.mxu1 }
 0x1cf   : > { %1666 = vst [vmem:[%s2780_s23 + $0x698] sm:$0xff] %v1102_v1  ;;  %v931_v2 = vpop.f32.mrf.mxu0 }
 0x1d0   : > { %1671 = vst [vmem:[%s2780_s23 + $0x6c0] sm:$0xff] %v931_v2  ;;  %v1104_v3 = vpop.f32.mrf.mxu1 }
 0x1d1   : > { %1673 = vst [vmem:[%s2780_s23 + $0x6d0] sm:$0xff] %v1104_v3  ;;  %v933_v5 = vpop.f32.mrf.mxu0 }
 0x1d2   : > { %1672 = vst [vmem:[%s2780_s23 + $0x6c8] sm:$0xff] %v933_v5  ;;  %v1106_v6 = vpop.f32.mrf.mxu1 }
 0x1d3   : > { %1674 = vst [vmem:[%s2780_s23 + $0x6d8] sm:$0xff] %v1106_v6  ;;  %v1143_v7 = vpop.f32.mrf.mxu0 }
 0x1d4   : > { %1459 = vst [vmem:[%s2780_s23 + $0x20] sm:$0xff] %v1143_v7  ;;  %v1316_v9 = vpop.f32.mrf.mxu1 }
 0x1d5   : > { %1461 = vst [vmem:[%s2780_s23 + $0x30] sm:$0xff] %v1316_v9  ;;  %v1145_v11 = vpop.f32.mrf.mxu0 }
 0x1d6   : > { %1460 = vst [vmem:[%s2780_s23 + $0x28] sm:$0xff] %v1145_v11  ;;  %v1318_v13 = vpop.f32.mrf.mxu1 }
 0x1d7   : > { %1462 = vst [vmem:[%s2780_s23 + $0x38] sm:$0xff] %v1318_v13  ;;  %v1147_v15 = vpop.f32.mrf.mxu0 }
 0x1d8   : > { %1467 = vst [vmem:[%s2780_s23 + $0x60] sm:$0xff] %v1147_v15  ;;  %v1320_v16 = vpop.f32.mrf.mxu1 }
 0x1d9   : > { %1469 = vst [vmem:[%s2780_s23 + $0x70] sm:$0xff] %v1320_v16  ;;  %v1149_v21 = vpop.f32.mrf.mxu0 }
 0x1da   : > { %1468 = vst [vmem:[%s2780_s23 + $0x68] sm:$0xff] %v1149_v21  ;;  %v1322_v22 = vpop.f32.mrf.mxu1 }
 0x1db   : > { %1470 = vst [vmem:[%s2780_s23 + $0x78] sm:$0xff] %v1322_v22  ;;  %v1153_v23 = vpop.f32.mrf.mxu0 }
 0x1dc   : > { %1475 = vst [vmem:[%s2780_s23 + $0xa0] sm:$0xff] %v1153_v23  ;;  %v1326_v24 = vpop.f32.mrf.mxu1 }
 0x1dd   : > { %1477 = vst [vmem:[%s2780_s23 + $0xb0] sm:$0xff] %v1326_v24  ;;  %v1155_v25 = vpop.f32.mrf.mxu0 }
 0x1de   : > { %1476 = vst [vmem:[%s2780_s23 + $0xa8] sm:$0xff] %v1155_v25  ;;  %v1328_v26 = vpop.f32.mrf.mxu1 }
 0x1df   : > { %1478 = vst [vmem:[%s2780_s23 + $0xb8] sm:$0xff] %v1328_v26  ;;  %v1157_v28 = vpop.f32.mrf.mxu0 }
 0x1e0   : > { %1483 = vst [vmem:[%s2780_s23 + $0xe0] sm:$0xff] %v1157_v28  ;;  %v1330_v30 = vpop.f32.mrf.mxu1 }
 0x1e1   : > { %1485 = vst [vmem:[%s2780_s23 + $0xf0] sm:$0xff] %v1330_v30  ;;  %v1159_v33 = vpop.f32.mrf.mxu0 }
 0x1e2   : > { %1484 = vst [vmem:[%s2780_s23 + $0xe8] sm:$0xff] %v1159_v33  ;;  %v1332_v12 = vpop.f32.mrf.mxu1 }
 0x1e3   : > { %1486 = vst [vmem:[%s2780_s23 + $0xf8] sm:$0xff] %v1332_v12  ;;  %v1163_v27 = vpop.f32.mrf.mxu0 }
 0x1e4   : > { %1491 = vst [vmem:[%s2780_s23 + $0x120] sm:$0xff] %v1163_v27  ;;  %v1336_v42 = vpop.f32.mrf.mxu1 }
 0x1e5   : > { %1493 = vst [vmem:[%s2780_s23 + $0x130] sm:$0xff] %v1336_v42  ;;  %v1165_v8 = vpop.f32.mrf.mxu0 }
 0x1e6   : > { %1492 = vst [vmem:[%s2780_s23 + $0x128] sm:$0xff] %v1165_v8  ;;  %v1338_v18 = vpop.f32.mrf.mxu1 }
 0x1e7   : > { %1494 = vst [vmem:[%s2780_s23 + $0x138] sm:$0xff] %v1338_v18  ;;  %v1167_v43 = vpop.f32.mrf.mxu0 }
 0x1e8   : > { %1499 = vst [vmem:[%s2780_s23 + $0x160] sm:$0xff] %v1167_v43  ;;  %v1340_v47 = vpop.f32.mrf.mxu1 }
 0x1e9   : > { %1501 = vst [vmem:[%s2780_s23 + $0x170] sm:$0xff] %v1340_v47  ;;  %v1169_v14 = vpop.f32.mrf.mxu0 }
 0x1ea   : > { %1500 = vst [vmem:[%s2780_s23 + $0x168] sm:$0xff] %v1169_v14  ;;  %v1342_v20 = vpop.f32.mrf.mxu1 }
 0x1eb   : > { %1502 = vst [vmem:[%s2780_s23 + $0x178] sm:$0xff] %v1342_v20  ;;  %v1173_v53 = vpop.f32.mrf.mxu0 }
 0x1ec   : > { %1507 = vst [vmem:[%s2780_s23 + $0x1a0] sm:$0xff] %v1173_v53  ;;  %v1346_v58 = vpop.f32.mrf.mxu1 }
 0x1ed   : > { %1509 = vst [vmem:[%s2780_s23 + $0x1b0] sm:$0xff] %v1346_v58  ;;  %v1175_v29 = vpop.f32.mrf.mxu0 }
 0x1ee   : > { %1508 = vst [vmem:[%s2780_s23 + $0x1a8] sm:$0xff] %v1175_v29  ;;  %v1348_v34 = vpop.f32.mrf.mxu1 }
 0x1ef   : > { %1510 = vst [vmem:[%s2780_s23 + $0x1b8] sm:$0xff] %v1348_v34  ;;  %v1177_v4 = vpop.f32.mrf.mxu0 }
 0x1f0   : > { %1515 = vst [vmem:[%s2780_s23 + $0x1e0] sm:$0xff] %v1177_v4  ;;  %v1350_v10 = vpop.f32.mrf.mxu1 }
 0x1f1   : > { %1517 = vst [vmem:[%s2780_s23 + $0x1f0] sm:$0xff] %v1350_v10  ;;  %v1179_v49 = vpop.f32.mrf.mxu0 }
 0x1f2   : > { %1516 = vst [vmem:[%s2780_s23 + $0x1e8] sm:$0xff] %v1179_v49  ;;  %v1352_v55 = vpop.f32.mrf.mxu1 }
 0x1f3   : > { %1518 = vst [vmem:[%s2780_s23 + $0x1f8] sm:$0xff] %v1352_v55  ;;  %v1183_v17 = vpop.f32.mrf.mxu0 }
 0x1f4   : > { %1523 = vst [vmem:[%s2780_s23 + $0x220] sm:$0xff] %v1183_v17  ;;  %v1356_v19 = vpop.f32.mrf.mxu1 }
 0x1f5   : > { %1525 = vst [vmem:[%s2780_s23 + $0x230] sm:$0xff] %v1356_v19  ;;  %v1185_v31 = vpop.f32.mrf.mxu0 }
 0x1f6   : > { %1524 = vst [vmem:[%s2780_s23 + $0x228] sm:$0xff] %v1185_v31  ;;  %v1358_v32 = vpop.f32.mrf.mxu1 }
 0x1f7   : > { %1526 = vst [vmem:[%s2780_s23 + $0x238] sm:$0xff] %v1358_v32  ;;  %v1187_v35 = vpop.f32.mrf.mxu0 }
 0x1f8   : > { %1531 = vst [vmem:[%s2780_s23 + $0x260] sm:$0xff] %v1187_v35  ;;  %v1360_v36 = vpop.f32.mrf.mxu1 }
 0x1f9   : > { %1533 = vst [vmem:[%s2780_s23 + $0x270] sm:$0xff] %v1360_v36  ;;  %v1189_v37 = vpop.f32.mrf.mxu0 }
 0x1fa   : > { %1532 = vst [vmem:[%s2780_s23 + $0x268] sm:$0xff] %v1189_v37  ;;  %v1362_v38 = vpop.f32.mrf.mxu1 }
 0x1fb   : > { %1534 = vst [vmem:[%s2780_s23 + $0x278] sm:$0xff] %v1362_v38  ;;  %v1193_v39 = vpop.f32.mrf.mxu0 }
 0x1fc   : > { %1539 = vst [vmem:[%s2780_s23 + $0x2a0] sm:$0xff] %v1193_v39  ;;  %v1366_v40 = vpop.f32.mrf.mxu1 }
 0x1fd   : > { %1541 = vst [vmem:[%s2780_s23 + $0x2b0] sm:$0xff] %v1366_v40  ;;  %v1195_v41 = vpop.f32.mrf.mxu0 }
 0x1fe   : > { %1540 = vst [vmem:[%s2780_s23 + $0x2a8] sm:$0xff] %v1195_v41  ;;  %v1368_v44 = vpop.f32.mrf.mxu1 }
 0x1ff   : > { %1542 = vst [vmem:[%s2780_s23 + $0x2b8] sm:$0xff] %v1368_v44  ;;  %v1197_v45 = vpop.f32.mrf.mxu0 }
 0x200   : > { %1547 = vst [vmem:[%s2780_s23 + $0x2e0] sm:$0xff] %v1197_v45  ;;  %v1370_v46 = vpop.f32.mrf.mxu1 }
 0x201   : > { %1549 = vst [vmem:[%s2780_s23 + $0x2f0] sm:$0xff] %v1370_v46  ;;  %v1199_v48 = vpop.f32.mrf.mxu0 }
 0x202   : > { %1548 = vst [vmem:[%s2780_s23 + $0x2e8] sm:$0xff] %v1199_v48  ;;  %v1372_v50 = vpop.f32.mrf.mxu1 }
 0x203   : > { %1550 = vst [vmem:[%s2780_s23 + $0x2f8] sm:$0xff] %v1372_v50  ;;  %v1203_v51 = vpop.f32.mrf.mxu0 }
 0x204   : > { %1555 = vst [vmem:[%s2780_s23 + $0x320] sm:$0xff] %v1203_v51  ;;  %v1376_v52 = vpop.f32.mrf.mxu1 }
 0x205   : > { %1557 = vst [vmem:[%s2780_s23 + $0x330] sm:$0xff] %v1376_v52  ;;  %v1205_v54 = vpop.f32.mrf.mxu0 }
 0x206   : > { %1556 = vst [vmem:[%s2780_s23 + $0x328] sm:$0xff] %v1205_v54  ;;  %v1378_v56 = vpop.f32.mrf.mxu1 }
 0x207   : > { %1558 = vst [vmem:[%s2780_s23 + $0x338] sm:$0xff] %v1378_v56  ;;  %v1207_v57 = vpop.f32.mrf.mxu0 }
 0x208   : > { %1563 = vst [vmem:[%s2780_s23 + $0x360] sm:$0xff] %v1207_v57  ;;  %v1380_v59 = vpop.f32.mrf.mxu1 }
 0x209   : > { %1565 = vst [vmem:[%s2780_s23 + $0x370] sm:$0xff] %v1380_v59  ;;  %v1209_v60 = vpop.f32.mrf.mxu0 }
 0x20a   : > { %1564 = vst [vmem:[%s2780_s23 + $0x368] sm:$0xff] %v1209_v60  ;;  %v1382_v61 = vpop.f32.mrf.mxu1 }
 0x20b   : > { %1566 = vst [vmem:[%s2780_s23 + $0x378] sm:$0xff] %v1382_v61  ;;  %v1213_v62 = vpop.f32.mrf.mxu0 }
 0x20c   : > { %1571 = vst [vmem:[%s2780_s23 + $0x3a0] sm:$0xff] %v1213_v62  ;;  %v1386_v63 = vpop.f32.mrf.mxu1 }
 0x20d   : > { %1573 = vst [vmem:[%s2780_s23 + $0x3b0] sm:$0xff] %v1386_v63  ;;  %v1215_v0 = vpop.f32.mrf.mxu0 }
 0x20e   : > { %1572 = vst [vmem:[%s2780_s23 + $0x3a8] sm:$0xff] %v1215_v0  ;;  %v1388_v1 = vpop.f32.mrf.mxu1 }
 0x20f   : > { %1574 = vst [vmem:[%s2780_s23 + $0x3b8] sm:$0xff] %v1388_v1  ;;  %v1217_v2 = vpop.f32.mrf.mxu0 }
 0x210   : > { %1579 = vst [vmem:[%s2780_s23 + $0x3e0] sm:$0xff] %v1217_v2  ;;  %v1390_v3 = vpop.f32.mrf.mxu1 }
 0x211   : > { %1581 = vst [vmem:[%s2780_s23 + $0x3f0] sm:$0xff] %v1390_v3  ;;  %v1219_v5 = vpop.f32.mrf.mxu0 }
 0x212   : > { %1580 = vst [vmem:[%s2780_s23 + $0x3e8] sm:$0xff] %v1219_v5  ;;  %v1392_v6 = vpop.f32.mrf.mxu1 }
 0x213   : > { %1582 = vst [vmem:[%s2780_s23 + $0x3f8] sm:$0xff] %v1392_v6  ;;  %v1223_v7 = vpop.f32.mrf.mxu0 }
 0x214   : > { %1587 = vst [vmem:[%s2780_s23 + $0x420] sm:$0xff] %v1223_v7  ;;  %v1396_v9 = vpop.f32.mrf.mxu1 }
 0x215   : > { %1589 = vst [vmem:[%s2780_s23 + $0x430] sm:$0xff] %v1396_v9  ;;  %v1225_v11 = vpop.f32.mrf.mxu0 }
 0x216   : > { %1588 = vst [vmem:[%s2780_s23 + $0x428] sm:$0xff] %v1225_v11  ;;  %v1398_v13 = vpop.f32.mrf.mxu1 }
 0x217   : > { %1590 = vst [vmem:[%s2780_s23 + $0x438] sm:$0xff] %v1398_v13  ;;  %v1227_v15 = vpop.f32.mrf.mxu0 }
 0x218   : > { %1595 = vst [vmem:[%s2780_s23 + $0x460] sm:$0xff] %v1227_v15  ;;  %v1400_v16 = vpop.f32.mrf.mxu1 }
 0x219   : > { %1597 = vst [vmem:[%s2780_s23 + $0x470] sm:$0xff] %v1400_v16  ;;  %v1229_v21 = vpop.f32.mrf.mxu0 }
 0x21a   : > { %1596 = vst [vmem:[%s2780_s23 + $0x468] sm:$0xff] %v1229_v21  ;;  %v1402_v22 = vpop.f32.mrf.mxu1 }
 0x21b   : > { %1598 = vst [vmem:[%s2780_s23 + $0x478] sm:$0xff] %v1402_v22  ;;  %v1233_v23 = vpop.f32.mrf.mxu0 }
 0x21c   : > { %1603 = vst [vmem:[%s2780_s23 + $0x4a0] sm:$0xff] %v1233_v23  ;;  %v1406_v24 = vpop.f32.mrf.mxu1 }
 0x21d   : > { %1605 = vst [vmem:[%s2780_s23 + $0x4b0] sm:$0xff] %v1406_v24  ;;  %v1235_v25 = vpop.f32.mrf.mxu0 }
 0x21e   : > { %1604 = vst [vmem:[%s2780_s23 + $0x4a8] sm:$0xff] %v1235_v25  ;;  %v1408_v26 = vpop.f32.mrf.mxu1 }
 0x21f   : > { %1606 = vst [vmem:[%s2780_s23 + $0x4b8] sm:$0xff] %v1408_v26  ;;  %v1237_v28 = vpop.f32.mrf.mxu0 }
 0x220   : > { %1611 = vst [vmem:[%s2780_s23 + $0x4e0] sm:$0xff] %v1237_v28  ;;  %v1410_v30 = vpop.f32.mrf.mxu1 }
 0x221   : > { %1613 = vst [vmem:[%s2780_s23 + $0x4f0] sm:$0xff] %v1410_v30  ;;  %v1239_v33 = vpop.f32.mrf.mxu0 }
 0x222   : > { %1612 = vst [vmem:[%s2780_s23 + $0x4e8] sm:$0xff] %v1239_v33  ;;  %v1412_v12 = vpop.f32.mrf.mxu1 }
 0x223   : > { %1614 = vst [vmem:[%s2780_s23 + $0x4f8] sm:$0xff] %v1412_v12  ;;  %v1243_v27 = vpop.f32.mrf.mxu0 }
 0x224   : > { %1619 = vst [vmem:[%s2780_s23 + $0x520] sm:$0xff] %v1243_v27  ;;  %v1416_v42 = vpop.f32.mrf.mxu1 }
 0x225   : > { %1621 = vst [vmem:[%s2780_s23 + $0x530] sm:$0xff] %v1416_v42  ;;  %v1245_v8 = vpop.f32.mrf.mxu0 }
 0x226   : > { %1620 = vst [vmem:[%s2780_s23 + $0x528] sm:$0xff] %v1245_v8  ;;  %v1418_v18 = vpop.f32.mrf.mxu1 }
 0x227   : > { %1622 = vst [vmem:[%s2780_s23 + $0x538] sm:$0xff] %v1418_v18  ;;  %v1247_v43 = vpop.f32.mrf.mxu0 }
 0x228   : > { %1627 = vst [vmem:[%s2780_s23 + $0x560] sm:$0xff] %v1247_v43  ;;  %v1420_v47 = vpop.f32.mrf.mxu1 }
 0x229   : > { %1629 = vst [vmem:[%s2780_s23 + $0x570] sm:$0xff] %v1420_v47  ;;  %v1249_v14 = vpop.f32.mrf.mxu0 }
 0x22a   : > { %1628 = vst [vmem:[%s2780_s23 + $0x568] sm:$0xff] %v1249_v14  ;;  %v1422_v20 = vpop.f32.mrf.mxu1 }
 0x22b   : > { %1630 = vst [vmem:[%s2780_s23 + $0x578] sm:$0xff] %v1422_v20  ;;  %v1253_v53 = vpop.f32.mrf.mxu0 }
 0x22c   : > { %1635 = vst [vmem:[%s2780_s23 + $0x5a0] sm:$0xff] %v1253_v53  ;;  %v1426_v58 = vpop.f32.mrf.mxu1 }
 0x22d   : > { %1637 = vst [vmem:[%s2780_s23 + $0x5b0] sm:$0xff] %v1426_v58  ;;  %v1255_v29 = vpop.f32.mrf.mxu0 }
 0x22e   : > { %1636 = vst [vmem:[%s2780_s23 + $0x5a8] sm:$0xff] %v1255_v29  ;;  %v1428_v34 = vpop.f32.mrf.mxu1 }
 0x22f   : > { %1638 = vst [vmem:[%s2780_s23 + $0x5b8] sm:$0xff] %v1428_v34  ;;  %v1257_v4 = vpop.f32.mrf.mxu0 }
 0x230   : > { %1643 = vst [vmem:[%s2780_s23 + $0x5e0] sm:$0xff] %v1257_v4  ;;  %v1430_v10 = vpop.f32.mrf.mxu1 }
 0x231   : > { %1645 = vst [vmem:[%s2780_s23 + $0x5f0] sm:$0xff] %v1430_v10  ;;  %v1259_v49 = vpop.f32.mrf.mxu0 }
 0x232   : > { %1644 = vst [vmem:[%s2780_s23 + $0x5e8] sm:$0xff] %v1259_v49  ;;  %v1432_v55 = vpop.f32.mrf.mxu1 }
 0x233   : > { %1646 = vst [vmem:[%s2780_s23 + $0x5f8] sm:$0xff] %v1432_v55  ;;  %v1263_v17 = vpop.f32.mrf.mxu0 }
 0x234   : > { %1651 = vst [vmem:[%s2780_s23 + $0x620] sm:$0xff] %v1263_v17  ;;  %v1436_v19 = vpop.f32.mrf.mxu1 }
 0x235   : > { %1653 = vst [vmem:[%s2780_s23 + $0x630] sm:$0xff] %v1436_v19  ;;  %v1265_v31 = vpop.f32.mrf.mxu0 }
 0x236   : > { %1652 = vst [vmem:[%s2780_s23 + $0x628] sm:$0xff] %v1265_v31  ;;  %v1438_v32 = vpop.f32.mrf.mxu1 }
 0x237   : > { %1654 = vst [vmem:[%s2780_s23 + $0x638] sm:$0xff] %v1438_v32  ;;  %v1267_v35 = vpop.f32.mrf.mxu0 }
 0x238   : > { %1659 = vst [vmem:[%s2780_s23 + $0x660] sm:$0xff] %v1267_v35  ;;  %v1440_v36 = vpop.f32.mrf.mxu1 }
 0x239   : > { %1661 = vst [vmem:[%s2780_s23 + $0x670] sm:$0xff] %v1440_v36  ;;  %v1269_v37 = vpop.f32.mrf.mxu0 }
 0x23a   : > { %1660 = vst [vmem:[%s2780_s23 + $0x668] sm:$0xff] %v1269_v37  ;;  %v1442_v38 = vpop.f32.mrf.mxu1 }
 0x23b   : > { %1662 = vst [vmem:[%s2780_s23 + $0x678] sm:$0xff] %v1442_v38  ;;  %v1273_v39 = vpop.f32.mrf.mxu0 }
 0x23c   : > { %1667 = vst [vmem:[%s2780_s23 + $0x6a0] sm:$0xff] %v1273_v39  ;;  %v1446_v40 = vpop.f32.mrf.mxu1 }
 0x23d   : > { %1669 = vst [vmem:[%s2780_s23 + $0x6b0] sm:$0xff] %v1446_v40  ;;  %v1275_v41 = vpop.f32.mrf.mxu0 }
 0x23e   : > { %1668 = vst [vmem:[%s2780_s23 + $0x6a8] sm:$0xff] %v1275_v41  ;;  %v1448_v44 = vpop.f32.mrf.mxu1 }
 0x23f   : > { %1670 = vst [vmem:[%s2780_s23 + $0x6b8] sm:$0xff] %v1448_v44  ;;  %v1277_v45 = vpop.f32.mrf.mxu0  ;;  %1686 = sbr.rel (!%p3113_p10) target bundleno = 609 (0x261), region = 48 }
 0x240   : > { %1675 = vst [vmem:[%s2780_s23 + $0x6e0] sm:$0xff] %v1277_v45  ;;  %v1450_v46 = vpop.f32.mrf.mxu1 }
 0x241   : > { %1677 = vst [vmem:[%s2780_s23 + $0x6f0] sm:$0xff] %v1450_v46  ;;  %v1279_v48 = vpop.f32.mrf.mxu0 }
 0x242   : > { %1676 = vst [vmem:[%s2780_s23 + $0x6e8] sm:$0xff] %v1279_v48  ;;  %v1452_v50 = vpop.f32.mrf.mxu1 }
 0x243   : > { %1678 = vst [vmem:[%s2780_s23 + $0x6f8] sm:$0xff] %v1452_v50 }
 0x244   : > { %s3122_s20 = smov (!%p1689_p1, %s1688_s20), 8 }
 0x245   : > { %s3035_s27 = smul.u32 3584, %s3122_s20 }
 0x247   : > { %s1693_s28 = ssub.s32 28672, %s3035_s27 }
 0x248   : > { %1694 = vsyncadd %s3027_s10, %s1693_s28  ;;  %p1863_p3 = scmp.ne.s32.totalorder %s3035_s27, 0  ;;  %s1871_s24 = sshll.u32 %s2143_s16, 10 }
 0x249   : > { %s3044_s6 = scalar_lea.hbm %s3096_s3, %s1871_s24  ;;  %s1865_s7 = sshll.u32 %s3122_s20, 3 }
 0x24a   : > { %s1700_s8 = sshll.u32 %s2780_s23, 4  ;;  %s2099_s19 = smov [#allocation8]   ;;  %s3048_s8 = int_to_ptr.vmem [resolvable:$true] %s1700_s8 }
 0x24b   : > { %s2018_s17 = scalar_lea.vmem %s3048_s8, %s3035_s27  ;;  %s2022_s29 = sshll.u32 %s2099_s19, 4  ;;  %s2023_s29 = int_to_ptr.vmem [resolvable:$false] %s2022_s29 }
 0x24c   : > { %p2019_p7 = scmp.ne.s32.totalorder %s3048_s8, %s2018_s17  ;;  %s2024_s16 = scalar_lea.vmem %s2023_s29, 57344 }
 0x24d   : > { %p2025_p4 = scmp.lt.s32.totalorder %s3048_s8, %s2023_s29  ;;  %p2026_p6 = scmp.lt.s32.totalorder %s2024_s16, %s2018_s17 }
 0x24e   : > { %p2020_p11 = pnand %p2019_p7, %p1863_p3 }
 0x24f   : > { %p2027_p13 = por %p2026_p6, %p2025_p4 }
 0x250   : > { %p2021_p12 = pneg %p2020_p11 }
 0x252   : > { %p2028_p0 = pnand %p2027_p13, %p2021_p12 }
 0x254   : > { %2031 = shalt.err (!%p2028_p0)
}
 0x255   : > { %s2032_s4 = scalar_lea.hbm %s3044_s6, %s3035_s27  ;;  %s2036_s9 = scalar_lea.hbm %s3096_s3, 89600 }
 0x256   : > { %p2033_p2 = scmp.ne.s32.totalorder %s3044_s6, %s2032_s4  ;;  %p2037_p5 = scmp.lt.s32.totalorder %s3044_s6, %s3096_s3 }
 0x257   : > { %p2038_p10 = scmp.lt.s32.totalorder %s2036_s9, %s2032_s4 }
 0x258   : > { %p2034_p8 = pnand %p2033_p2, %p1863_p3 }
 0x259   : > { %p2039_p1 = por %p2038_p10, %p2037_p5 }
 0x25a   : > { %p2035_p9 = pneg %p2034_p8 }
 0x25c   : > { %p2040_p7 = pnand %p2039_p1, %p2035_p9 }
 0x25e   : > { %2043 = shalt.err (!%p2040_p7)
}
 0x25f   : > { %s2100_s28 = smov 1024   ;;  %s2101_s24 = smov 3200  }
 0x260   : > { %1706 = dma.vmem_to_hbm [thread:$0]  (%p1863_p3), %s3048_s8, %s3035_s27, %s3044_s6, %s3027_s10, %s2100_s28, %s2101_s24, %s1865_s7  }
 0x261 PF: > { %p1899_p11 = scmp.ge.s32.totalorder %s2090_s15, 2  ;;  %s1715_s30 = sand.u32 1, %s2078_s12  }
 0x262   : > { %p3114_p12 = scmp.ne.s32.totalorder %s3103_s25, 0  ;;  %s1716_s22 = scalar_lea.sflag [#allocation4], %s1715_s30 }
 0x264   : > { %p1892_p4 = pnand %p1899_p11, %p3114_p12 }
 0x266   : > { %p1893_p6 = pneg %p1892_p4 }
 0x268   : > { %2073 = dma.done.wait (%p1893_p6), %s1716_s22, 28672  }
 0x269   : > { %2075 = vsyncadd (%p1893_p6), %s1716_s22, 4294938624  ;;  %p15_p13 = scmp.ge.s32.totalorder %s2147_s18, 6   ;;  %s3115_s12 = smov %s2082_s13 }
 0x26a   : > { %s3116_s13 = smov %s2086_s14  ;;  %s3117_s14 = smov %s2159_s21 }
 0x26b   : > { %s3118_s15 = smov %s2147_s18  ;;  %17 = sbr.rel (!%p15_p13) target bundleno = 5 (0x5), region = 84 }
 0x270   :  { %1721 = vsyncpa [#allocation3], 1 }
 0x271   :  { %1723 = vsyncpa [#allocation3 + $0x1], 1 }
 0x272   :  { %1724 = vsyncpa [#allocation6], 1 }
 0x273   :  { %1725 = vsyncpa [#allocation4], 1 }
 0x274   :  { %1727 = vsyncpa [#allocation4 + $0x1], 1 }

</bundles_post_ra>
